<compile_context>
chip_gen: v6e
topology: v6e:2x2x1
jax: 0.10.0
libtpu: 0.0.40
codegen_flags: <defaults>
</compile_context>

<pallas_src>
import functools

import jax
import jax.numpy as jnp
from jax import lax
from jax.experimental import pallas as pl
from jax.experimental.pallas import tpu as pltpu


def _lightconv_kernel(x_ref, w1_ref, b1_ref, wdw_ref, b2_ref, out_ref, pad_ref, *, k):
    """One batch element: (H, W, c1) -> (H, W, c2), channels on the 128-lane axis."""
    H, W, c1 = x_ref.shape
    c2 = out_ref.shape[-1]
    p = k // 2
    f32 = jnp.float32

    # --- 1x1 conv (BN1 scale folded into the weight) + BN1 bias ---------------
    # Computed ONCE (hoisted out of the tap loop): bf16 x bf16 -> f32 on the MXU.
    x2d = x_ref[...].reshape(H * W, c1)
    mid = jnp.dot(x2d, w1_ref[...], preferred_element_type=f32) + b1_ref[...]

    # --- depthwise k x k 'same' conv (BN2 scale folded into the taps) ---------
    # Zero-pad the intermediate in VMEM and take k*k statically shifted views;
    # no im2col tensor ever exists in HBM.
    pad_ref[...] = jnp.zeros_like(pad_ref)
    pad_ref[p:p + H, p:p + W, :] = mid.reshape(H, W, c2)

    wdw = wdw_ref[...]                                   # (k*k, c2), f32
    acc = pad_ref[0:H, 0:W, :] * wdw[0].reshape(1, 1, c2)
    for t in range(1, k * k):
        dh, dw = t // k, t % k
        acc = acc + pad_ref[dh:dh + H, dw:dw + W, :] * wdw[t].reshape(1, 1, c2)

    # --- BN2 bias + ReLU -------------------------------------------------------
    y = acc + b2_ref[...].reshape(1, 1, c2)
    out_ref[...] = jnp.maximum(y, 0.0).astype(out_ref.dtype)


def init_lightconv_params(c1, c2, k=3, seed=0):
    """Deterministic synthetic parameters; shapes follow LightConv.__init__."""
    keys = jax.random.split(jax.random.PRNGKey(seed), 10)
    return dict(
        # Conv(c1, c2, 1, act=False): 1x1 conv (no bias) + BatchNorm2d
        w_conv1=jax.random.normal(keys[0], (c2, c1), jnp.float32) * 0.2,   # torch OI
        bn1_gamma=1.0 + 0.1 * jax.random.normal(keys[1], (c2,), jnp.float32),
        bn1_beta=0.1 * jax.random.normal(keys[2], (c2,), jnp.float32),
        bn1_mean=0.1 * jax.random.normal(keys[3], (c2,), jnp.float32),
        bn1_var=jnp.abs(1.0 + 0.1 * jax.random.normal(keys[4], (c2,), jnp.float32)),
        # DWConv(c2, c2, k, act=ReLU): depthwise kxk conv (no bias) + BatchNorm2d
        w_dw=jax.random.normal(keys[5], (c2, 1, k, k), jnp.float32) * 0.2,  # torch OIHW, groups=c2
        bn2_gamma=1.0 + 0.1 * jax.random.normal(keys[6], (c2,), jnp.float32),
        bn2_beta=0.1 * jax.random.normal(keys[7], (c2,), jnp.float32),
        bn2_mean=0.1 * jax.random.normal(keys[8], (c2,), jnp.float32),
        bn2_var=jnp.abs(1.0 + 0.1 * jax.random.normal(keys[9], (c2,), jnp.float32)),
        eps=1e-5,  # torch BatchNorm2d default
    )


def fold_params(params, dtype=jnp.bfloat16):
    """Fold the inference-mode BatchNorms into the conv weights (exact algebra)."""
    eps = params["eps"]
    s1 = params["bn1_gamma"] * lax.rsqrt(params["bn1_var"] + eps)
    b1 = params["bn1_beta"] - params["bn1_mean"] * s1
    s2 = params["bn2_gamma"] * lax.rsqrt(params["bn2_var"] + eps)
    b2 = params["bn2_beta"] - params["bn2_mean"] * s2

    c2, c1 = params["w_conv1"].shape
    k = params["w_dw"].shape[-1]
    # 1x1 conv weight -> (c1, c2) matmul layout with BN1 scale folded in (bf16 storage).
    w1 = (params["w_conv1"].T * s1[None, :]).astype(dtype)
    # depthwise weight (c2, 1, k, k) -> (k*k, c2) per-tap rows with BN2 scale folded in.
    wdw = (jnp.transpose(params["w_dw"][:, 0], (1, 2, 0)).reshape(k * k, c2)
           * s2[None, :]).astype(jnp.float32)
    return dict(
        w1=w1,
        b1=b1.reshape(1, c2).astype(jnp.float32),
        wdw=wdw,
        b2=b2.reshape(1, c2).astype(jnp.float32),
    )


def lightconv_pallas(x, params, dtype=jnp.bfloat16):
    """x: (B, c1, H, W) float32 NCHW -> (B, c2, H, W) float32."""
    B, c1, H, W = x.shape
    eff = fold_params(params, dtype)
    c2 = eff["w1"].shape[1]
    k = int(round(eff["wdw"].shape[0] ** 0.5))

    # channels-last so channels map to lanes; W (multiple of 8 here) to sublanes.
    x_nhwc = jnp.transpose(x, (0, 2, 3, 1)).astype(dtype)

    itemsize = jnp.dtype(dtype).itemsize
    block_bytes = (
        2 * H * W * c1 * itemsize                              # x block, double-buffered
        + 2 * H * W * c2 * 4                                   # out block, double-buffered
        + 2 * (c1 * c2 * itemsize + (k * k + 2) * c2 * 4)      # weights (double-buffered)
        + (H + k - 1) * (W + k - 1) * c2 * 4                   # pad scratch
        + 4 * H * W * c2 * 4                                   # live f32 intermediates
    )
    vmem_limit = int(min(max(block_bytes + (8 << 20), 32 << 20), 64 << 20))

    out = pl.pallas_call(
        functools.partial(_lightconv_kernel, k=k),
        out_shape=jax.ShapeDtypeStruct((B, H, W, c2), jnp.float32),
        grid=(B,),
        in_specs=[
            pl.BlockSpec((None, H, W, c1), lambda b: (b, 0, 0, 0)),   # batch dim squeezed
            pl.BlockSpec((c1, c2), lambda b: (0, 0)),                 # folded 1x1 weight (bf16)
            pl.BlockSpec((1, c2), lambda b: (0, 0)),                  # BN1 bias (f32)
            pl.BlockSpec((k * k, c2), lambda b: (0, 0)),              # folded depthwise taps (f32)
            pl.BlockSpec((1, c2), lambda b: (0, 0)),                  # BN2 bias (f32)
        ],
        out_specs=pl.BlockSpec((None, H, W, c2), lambda b: (b, 0, 0, 0)),
        scratch_shapes=[pltpu.VMEM((H + k - 1, W + k - 1, c2), jnp.float32)],
        compiler_params=pltpu.CompilerParams(
            dimension_semantics=("parallel",),
            vmem_limit_bytes=vmem_limit,
        ),
    )(x_nhwc, eff["w1"], eff["b1"], eff["wdw"], eff["b2"])

    return jnp.transpose(out, (0, 3, 1, 2))


def lightconv_reference(x, params, dtype=jnp.bfloat16):
    """Pure-JAX LightConv forward (NCHW, inference-mode BN).

    Consumes the same bf16-quantized (scale-folded) 1x1 weight and bf16-cast
    input as the kernel, so the comparison isolates kernel correctness from
    bf16 parameter/input rounding.
    """
    eps = params["eps"]
    eff = fold_params(params, dtype)

    x_q = x.astype(dtype).astype(jnp.float32)
    w1_q = eff["w1"].astype(jnp.float32)                       # (c1, c2)
    mid = jnp.einsum("bchw,cd->bdhw", x_q, w1_q,
                     precision=lax.Precision.HIGHEST) + eff["b1"].reshape(1, -1, 1, 1)

    k = params["w_dw"].shape[-1]
    pad = k // 2
    z = lax.conv_general_dilated(
        mid, params["w_dw"], window_strides=(1, 1),
        padding=((pad, pad), (pad, pad)),
        dimension_numbers=("NCHW", "OIHW", "NCHW"),
        feature_group_count=mid.shape[1],
        precision=lax.Precision.HIGHEST)
    s2 = params["bn2_gamma"] * lax.rsqrt(params["bn2_var"] + eps)
    b2 = params["bn2_beta"] - params["bn2_mean"] * s2
    y = z * s2.reshape(1, -1, 1, 1) + b2.reshape(1, -1, 1, 1)
    return jnp.maximum(y, 0.0)


if __name__ == "__main__":
    B, C1, C2, H, W, K = 2, 8, 16, 16, 16, 3
    params = init_lightconv_params(C1, C2, k=K, seed=0)
    x = jax.random.normal(jax.random.PRNGKey(0), (B, C1, H, W), jnp.float32)

    out = lightconv_pallas(x, params)
    jax.block_until_ready(out)

    ref = lightconv_reference(x, params)
    assert out.shape == (B, C2, H, W), out.shape
    max_err = float(jnp.max(jnp.abs(out - ref)))
    assert jnp.allclose(out, ref, atol=1e-3, rtol=1e-3), f"max_err={max_err}"
    print("KERNEL_OK")
</pallas_src>

<mosaic_0001>
module attributes {stable_mosaic.version = 11 : i64} {
  func.func @_lightconv_kernel(%arg0: i32, %arg1: memref<1x16x16x8xbf16, #tpu.memory_space<vmem>>, %arg2: memref<8x16xbf16, #tpu.memory_space<vmem>>, %arg3: memref<1x16xf32, #tpu.memory_space<vmem>>, %arg4: memref<9x16xf32, #tpu.memory_space<vmem>>, %arg5: memref<1x16xf32, #tpu.memory_space<vmem>>, %arg6: memref<1x16x16x16xf32, #tpu.memory_space<vmem>>, %arg7: memref<18x18x16xf32, #tpu.memory_space<vmem>>) attributes {dimension_semantics = [#tpu.dimension_semantics<parallel>], iteration_bounds = array<i64: 2>, scalar_prefetch = 0 : i64, scratch_operands = 1 : i64, tpu.core_type = #tpu.core_type<tc>, window_params = [{transform_indices = @transform_0, window_bounds = array<i64: 1, 16, 16, 8>}, {pipeline_mode = #tpu.pipeline_mode<synchronous>, transform_indices = @transform_1, window_bounds = array<i64: 8, 16>}, {pipeline_mode = #tpu.pipeline_mode<synchronous>, transform_indices = @transform_2, window_bounds = array<i64: 1, 16>}, {pipeline_mode = #tpu.pipeline_mode<synchronous>, transform_indices = @transform_3, window_bounds = array<i64: 9, 16>}, {pipeline_mode = #tpu.pipeline_mode<synchronous>, transform_indices = @transform_4, window_bounds = array<i64: 1, 16>}, {transform_indices = @transform_5, window_bounds = array<i64: 1, 16, 16, 16>}]} {
    %c0 = arith.constant 0 : index
    %c0_0 = arith.constant 0 : index
    %c0_1 = arith.constant 0 : index
    %c0_2 = arith.constant 0 : index
    %0 = vector.load %arg1[%c0, %c0_0, %c0_1, %c0_2] : memref<1x16x16x8xbf16, #tpu.memory_space<vmem>>, vector<1x16x16x8xbf16>
    %1 = vector.shape_cast %0 : vector<1x16x16x8xbf16> to vector<16x16x8xbf16>
    %2 = vector.shape_cast %1 : vector<16x16x8xbf16> to vector<256x8xbf16>
    %c0_3 = arith.constant 0 : index
    %c0_4 = arith.constant 0 : index
    %3 = vector.load %arg2[%c0_3, %c0_4] : memref<8x16xbf16, #tpu.memory_space<vmem>>, vector<8x16xbf16>
    %cst = arith.constant dense<0.000000e+00> : vector<256x16xf32>
    %4 = tpu.matmul %2, %3, %cst {dimension_numbers = #tpu.dot_dimension_numbers<[1], [0], [0], [1], [0, 0, 1, 1], [], []>} : vector<256x8xbf16>, vector<8x16xbf16>, vector<256x16xf32> -> vector<256x16xf32>
    %c0_5 = arith.constant 0 : index
    %c0_6 = arith.constant 0 : index
    %5 = vector.load %arg3[%c0_5, %c0_6] : memref<1x16xf32, #tpu.memory_space<vmem>>, vector<1x16xf32>
    %6 = vector.broadcast %5 : vector<1x16xf32> to vector<256x16xf32>
    %7 = arith.addf %4, %6 : vector<256x16xf32>
    %cst_7 = arith.constant 0.000000e+00 : f32
    %8 = vector.broadcast %cst_7 : f32 to vector<18x18x16xf32>
    %c0_8 = arith.constant 0 : index
    %c0_9 = arith.constant 0 : index
    %c0_10 = arith.constant 0 : index
    %9 = vector.load %arg7[%c0_8, %c0_9, %c0_10] : memref<18x18x16xf32, #tpu.memory_space<vmem>>, vector<18x18x16xf32>
    tpu.vector_store %arg7[%c0_8, %c0_9, %c0_10], %8 {strides = array<i32>} : memref<18x18x16xf32, #tpu.memory_space<vmem>>, vector<18x18x16xf32>,
    %10 = vector.shape_cast %7 : vector<256x16xf32> to vector<16x16x16xf32>
    %c1 = arith.constant 1 : index
    %c1_11 = arith.constant 1 : index
    %c0_12 = arith.constant 0 : index
    %11 = vector.load %arg7[%c1, %c1_11, %c0_12] : memref<18x18x16xf32, #tpu.memory_space<vmem>>, vector<16x16x16xf32>
    tpu.vector_store %arg7[%c1, %c1_11, %c0_12], %10 {strides = array<i32>} : memref<18x18x16xf32, #tpu.memory_space<vmem>>, vector<16x16x16xf32>,
    %c0_13 = arith.constant 0 : index
    %c0_14 = arith.constant 0 : index
    %12 = vector.load %arg4[%c0_13, %c0_14] : memref<9x16xf32, #tpu.memory_space<vmem>>, vector<9x16xf32>
    %c0_15 = arith.constant 0 : index
    %c0_16 = arith.constant 0 : index
    %c0_17 = arith.constant 0 : index
    %13 = vector.load %arg7[%c0_15, %c0_16, %c0_17] : memref<18x18x16xf32, #tpu.memory_space<vmem>>, vector<16x16x16xf32>
    %14 = vector.extract_strided_slice %12 {offsets = [0, 0], sizes = [1, 16], strides = [1, 1]} : vector<9x16xf32> to vector<1x16xf32>
    %15 = vector.shape_cast %14 : vector<1x16xf32> to vector<16xf32>
    %16 = vector.shape_cast %15 : vector<16xf32> to vector<1x1x16xf32>
    %17 = vector.broadcast %16 : vector<1x1x16xf32> to vector<16x16x16xf32>
    %18 = arith.mulf %13, %17 : vector<16x16x16xf32>
    %c0_18 = arith.constant 0 : index
    %c1_19 = arith.constant 1 : index
    %c0_20 = arith.constant 0 : index
    %19 = vector.load %arg7[%c0_18, %c1_19, %c0_20] : memref<18x18x16xf32, #tpu.memory_space<vmem>>, vector<16x16x16xf32>
    %20 = vector.extract_strided_slice %12 {offsets = [1, 0], sizes = [1, 16], strides = [1, 1]} : vector<9x16xf32> to vector<1x16xf32>
    %21 = vector.shape_cast %20 : vector<1x16xf32> to vector<16xf32>
    %22 = vector.shape_cast %21 : vector<16xf32> to vector<1x1x16xf32>
    %23 = vector.broadcast %22 : vector<1x1x16xf32> to vector<16x16x16xf32>
    %24 = arith.mulf %19, %23 : vector<16x16x16xf32>
    %25 = arith.addf %18, %24 : vector<16x16x16xf32>
    %c0_21 = arith.constant 0 : index
    %c2 = arith.constant 2 : index
    %c0_22 = arith.constant 0 : index
    %26 = vector.load %arg7[%c0_21, %c2, %c0_22] : memref<18x18x16xf32, #tpu.memory_space<vmem>>, vector<16x16x16xf32>
    %27 = vector.extract_strided_slice %12 {offsets = [2, 0], sizes = [1, 16], strides = [1, 1]} : vector<9x16xf32> to vector<1x16xf32>
    %28 = vector.shape_cast %27 : vector<1x16xf32> to vector<16xf32>
    %29 = vector.shape_cast %28 : vector<16xf32> to vector<1x1x16xf32>
    %30 = vector.broadcast %29 : vector<1x1x16xf32> to vector<16x16x16xf32>
    %31 = arith.mulf %26, %30 : vector<16x16x16xf32>
    %32 = arith.addf %25, %31 : vector<16x16x16xf32>
    %c1_23 = arith.constant 1 : index
    %c0_24 = arith.constant 0 : index
    %c0_25 = arith.constant 0 : index
    %33 = vector.load %arg7[%c1_23, %c0_24, %c0_25] : memref<18x18x16xf32, #tpu.memory_space<vmem>>, vector<16x16x16xf32>
    %34 = vector.extract_strided_slice %12 {offsets = [3, 0], sizes = [1, 16], strides = [1, 1]} : vector<9x16xf32> to vector<1x16xf32>
    %35 = vector.shape_cast %34 : vector<1x16xf32> to vector<16xf32>
    %36 = vector.shape_cast %35 : vector<16xf32> to vector<1x1x16xf32>
    %37 = vector.broadcast %36 : vector<1x1x16xf32> to vector<16x16x16xf32>
    %38 = arith.mulf %33, %37 : vector<16x16x16xf32>
    %39 = arith.addf %32, %38 : vector<16x16x16xf32>
    %c1_26 = arith.constant 1 : index
    %c1_27 = arith.constant 1 : index
    %c0_28 = arith.constant 0 : index
    %40 = vector.load %arg7[%c1_26, %c1_27, %c0_28] : memref<18x18x16xf32, #tpu.memory_space<vmem>>, vector<16x16x16xf32>
    %41 = vector.extract_strided_slice %12 {offsets = [4, 0], sizes = [1, 16], strides = [1, 1]} : vector<9x16xf32> to vector<1x16xf32>
    %42 = vector.shape_cast %41 : vector<1x16xf32> to vector<16xf32>
    %43 = vector.shape_cast %42 : vector<16xf32> to vector<1x1x16xf32>
    %44 = vector.broadcast %43 : vector<1x1x16xf32> to vector<16x16x16xf32>
    %45 = arith.mulf %40, %44 : vector<16x16x16xf32>
    %46 = arith.addf %39, %45 : vector<16x16x16xf32>
    %c1_29 = arith.constant 1 : index
    %c2_30 = arith.constant 2 : index
    %c0_31 = arith.constant 0 : index
    %47 = vector.load %arg7[%c1_29, %c2_30, %c0_31] : memref<18x18x16xf32, #tpu.memory_space<vmem>>, vector<16x16x16xf32>
    %48 = vector.extract_strided_slice %12 {offsets = [5, 0], sizes = [1, 16], strides = [1, 1]} : vector<9x16xf32> to vector<1x16xf32>
    %49 = vector.shape_cast %48 : vector<1x16xf32> to vector<16xf32>
    %50 = vector.shape_cast %49 : vector<16xf32> to vector<1x1x16xf32>
    %51 = vector.broadcast %50 : vector<1x1x16xf32> to vector<16x16x16xf32>
    %52 = arith.mulf %47, %51 : vector<16x16x16xf32>
    %53 = arith.addf %46, %52 : vector<16x16x16xf32>
    %c2_32 = arith.constant 2 : index
    %c0_33 = arith.constant 0 : index
    %c0_34 = arith.constant 0 : index
    %54 = vector.load %arg7[%c2_32, %c0_33, %c0_34] : memref<18x18x16xf32, #tpu.memory_space<vmem>>, vector<16x16x16xf32>
    %55 = vector.extract_strided_slice %12 {offsets = [6, 0], sizes = [1, 16], strides = [1, 1]} : vector<9x16xf32> to vector<1x16xf32>
    %56 = vector.shape_cast %55 : vector<1x16xf32> to vector<16xf32>
    %57 = vector.shape_cast %56 : vector<16xf32> to vector<1x1x16xf32>
    %58 = vector.broadcast %57 : vector<1x1x16xf32> to vector<16x16x16xf32>
    %59 = arith.mulf %54, %58 : vector<16x16x16xf32>
    %60 = arith.addf %53, %59 : vector<16x16x16xf32>
    %c2_35 = arith.constant 2 : index
    %c1_36 = arith.constant 1 : index
    %c0_37 = arith.constant 0 : index
    %61 = vector.load %arg7[%c2_35, %c1_36, %c0_37] : memref<18x18x16xf32, #tpu.memory_space<vmem>>, vector<16x16x16xf32>
    %62 = vector.extract_strided_slice %12 {offsets = [7, 0], sizes = [1, 16], strides = [1, 1]} : vector<9x16xf32> to vector<1x16xf32>
    %63 = vector.shape_cast %62 : vector<1x16xf32> to vector<16xf32>
    %64 = vector.shape_cast %63 : vector<16xf32> to vector<1x1x16xf32>
    %65 = vector.broadcast %64 : vector<1x1x16xf32> to vector<16x16x16xf32>
    %66 = arith.mulf %61, %65 : vector<16x16x16xf32>
    %67 = arith.addf %60, %66 : vector<16x16x16xf32>
    %c2_38 = arith.constant 2 : index
    %c2_39 = arith.constant 2 : index
    %c0_40 = arith.constant 0 : index
    %68 = vector.load %arg7[%c2_38, %c2_39, %c0_40] : memref<18x18x16xf32, #tpu.memory_space<vmem>>, vector<16x16x16xf32>
    %69 = vector.extract_strided_slice %12 {offsets = [8, 0], sizes = [1, 16], strides = [1, 1]} : vector<9x16xf32> to vector<1x16xf32>
    %70 = vector.shape_cast %69 : vector<1x16xf32> to vector<16xf32>
    %71 = vector.shape_cast %70 : vector<16xf32> to vector<1x1x16xf32>
    %72 = vector.broadcast %71 : vector<1x1x16xf32> to vector<16x16x16xf32>
    %73 = arith.mulf %68, %72 : vector<16x16x16xf32>
    %74 = arith.addf %67, %73 : vector<16x16x16xf32>
    %c0_41 = arith.constant 0 : index
    %c0_42 = arith.constant 0 : index
    %75 = vector.load %arg5[%c0_41, %c0_42] : memref<1x16xf32, #tpu.memory_space<vmem>>, vector<1x16xf32>
    %76 = vector.shape_cast %75 : vector<1x16xf32> to vector<1x1x16xf32>
    %77 = vector.broadcast %76 : vector<1x1x16xf32> to vector<16x16x16xf32>
    %78 = arith.addf %74, %77 : vector<16x16x16xf32>
    %cst_43 = arith.constant 0.000000e+00 : f32
    %79 = vector.broadcast %cst_43 : f32 to vector<16x16x16xf32>
    %80 = arith.maximumf %78, %79 : vector<16x16x16xf32>
    %c0_44 = arith.constant 0 : index
    %c0_45 = arith.constant 0 : index
    %c0_46 = arith.constant 0 : index
    %c0_47 = arith.constant 0 : index
    %81 = vector.load %arg6[%c0_44, %c0_45, %c0_46, %c0_47] : memref<1x16x16x16xf32, #tpu.memory_space<vmem>>, vector<1x16x16x16xf32>
    %82 = vector.shape_cast %81 : vector<1x16x16x16xf32> to vector<16x16x16xf32>
    %83 = vector.shape_cast %80 : vector<16x16x16xf32> to vector<1x16x16x16xf32>
    tpu.vector_store %arg6[%c0_44, %c0_45, %c0_46, %c0_47], %83 {strides = array<i32>} : memref<1x16x16x16xf32, #tpu.memory_space<vmem>>, vector<1x16x16x16xf32>,
    return
  }
  func.func @transform_0(%arg0: i32) -> (i32, i32, i32, i32) {
    %c0_i32 = arith.constant 0 : i32
    %c0_i32_0 = arith.constant 0 : i32
    %c0_i32_1 = arith.constant 0 : i32
    %c0_i32_2 = arith.constant 0 : i32
    return %arg0, %c0_i32, %c0_i32_0, %c0_i32_1 : i32, i32, i32, i32
  }
  func.func @transform_1(%arg0: i32) -> (i32, i32) {
    %c0_i32 = arith.constant 0 : i32
    %c0_i32_0 = arith.constant 0 : i32
    %c0_i32_1 = arith.constant 0 : i32
    return %c0_i32, %c0_i32_0 : i32, i32
  }
  func.func @transform_2(%arg0: i32) -> (i32, i32) {
    %c0_i32 = arith.constant 0 : i32
    %c0_i32_0 = arith.constant 0 : i32
    %c0_i32_1 = arith.constant 0 : i32
    return %c0_i32, %c0_i32_0 : i32, i32
  }
  func.func @transform_3(%arg0: i32) -> (i32, i32) {
    %c0_i32 = arith.constant 0 : i32
    %c0_i32_0 = arith.constant 0 : i32
    %c0_i32_1 = arith.constant 0 : i32
    return %c0_i32, %c0_i32_0 : i32, i32
  }
  func.func @transform_4(%arg0: i32) -> (i32, i32) {
    %c0_i32 = arith.constant 0 : i32
    %c0_i32_0 = arith.constant 0 : i32
    %c0_i32_1 = arith.constant 0 : i32
    return %c0_i32, %c0_i32_0 : i32, i32
  }
  func.func @transform_5(%arg0: i32) -> (i32, i32, i32, i32) {
    %c0_i32 = arith.constant 0 : i32
    %c0_i32_0 = arith.constant 0 : i32
    %c0_i32_1 = arith.constant 0 : i32
    %c0_i32_2 = arith.constant 0 : i32
    return %arg0, %c0_i32, %c0_i32_0, %c0_i32_1 : i32, i32, i32, i32
  }
}

</mosaic_0001>

<bundles_post_ra>
// kernel: tpu_custom_call.1
= control target key start
LH: loop header
LB: loop body
LE: loop exit
PB: predicated region body
PF: predicated region fallthrough
CT: control target
= control target key end

     0   :  { %10 = vsyncpa [#allocation4], 0  ;;  %s3138_s0 = inlined_call_operand.vmem [shape: bf16[2,16,16,8], index: 0, kind: input, shape index: {}]   ;;  %s3139_s1 = inlined_call_operand.vmem [shape: bf16[8,16], index: 1, kind: input, shape index: {}]   ;;  %s3140_s2 = inlined_call_operand.vmem [shape: f32[1,16], index: 2, kind: input, shape index: {}]   ;;  %s3141_s3 = inlined_call_operand.vmem [shape: f32[9,16], index: 3, kind: input, shape index: {}]   ;;  %s3142_s4 = inlined_call_operand.vmem [shape: f32[1,16], index: 4, kind: input, shape index: {}]   ;;  %s3143_s5 = inlined_call_operand.hbm [shape: f32[2,16,16,16], index: 5, kind: output, shape index: {}]  }
   0x1   :  { %12 = vsyncpa [#allocation4 + $0x1], 0  ;;  %s1957_s18 = smov 0   ;;  %s1959_s19 = smov 0  }
   0x2   :  { %s1961_s20 = smov 0   ;;  %s1963_s21 = smov 0  }
   0x3 LB: > { %s1978_s22 = sadd.s32 4294967295, %s1921_s21   ;;  %s1697_s23 = sadd.s32 4294967294, %s1921_s21   ;;  %s1921_s21 = sphi %s1963_s21, %s3269_s21   ;;  %s1917_s20 = sphi %s1961_s20, %s3268_s20   ;;  %s1913_s19 = sphi %s1959_s19, %s3267_s19   ;;  %s1909_s18 = sphi %s1957_s18, %s3266_s18  }
   0x4   : > { %s1982_s24 = sadd.s32 1, %s1921_s21   ;;  %s135_s25 = sadd.s32 1, %s1917_s20 }
   0x5   : > { %s132_s26 = ssub.s32 %s1921_s21, %s1982_s24  ;;  %p145_p0 = scmp.ne.s32.totalorder %s1917_s20, %s1913_s19 }
   0x6   : > { %p133_p1 = scmp.eq.s32.totalorder %s132_s26, 0  ;;  %p146_p2 = scmp.eq.s32.totalorder %s1978_s22, 1 }
   0x7   : > { %p151_p3 = scmp.ne.s32.totalorder %s1913_s19, %s1909_s18  ;;  %p152_p4 = scmp.eq.s32.totalorder %s1697_s23, 1 }
   0x8   : > { %s1993_s27 = scalar_select %p133_p1, %s1917_s20, %s135_s25  }
   0x9   : > { %p1995_p5 = por %p146_p2, %p145_p0  ;;  %p1999_p6 = por %p152_p4, %p151_p3 }
   0xa   : > { %p1700_p7 = scmp.ge.s32.totalorder %s1921_s21, 1  ;;  %p190_p8 = scmp.lt.s32.totalorder %s1921_s21, 3 }
   0xc   : > { %p191_p9 = pnand %p1700_p7, %p190_p8 }
   0xe   : > { %194 = sbr.rel (%p191_p9) target bundleno = 413 (0x19d), region = 40 }
  0x13   : > { %v256_v0 = vld [vmem:[%s3139_s1] sm:$0xf]  ;;  %vm393_vm0 = vcmask 1043456   ;;  %p218_p10 = scmp.lt.s32.totalorder %s1978_s22, 1  ;;  %vm344_vm1 = vcmask 64512   ;;  %vm558_vm2 = vcmask 130048   ;;  %v681_v19 = vlaneseq }
  0x14   : > { %1799 = vmatprep.subr.msk.bf16.mxu0 %vm393_vm0, %v256_v0  ;;  %1800 = vmatprep.subr.msk.bf16.mxu1 %vm393_vm0, %v256_v0  ;;  %v395_v1 = vsel %vm393_vm0, %v256_v0, 0  ;;  %v1923_v18 = vmov 0.0   ;;  %vm561_vm3 = vcmask 123904   ;;  %v2108_v23 = vld [vmem:[%s3141_s3] sm:$0xff]  ;;  %s215_s23 = sand.u32 1, %s1913_s19   ;;  %s1924_s17 = smov [#allocation3]  }
  0x15   : > { %1764 = vmatpush3.bf16.msra.mxu0 %v395_v1  ;;  %1798 = vmatpush3.bf16.msra.mxu1 %v395_v1  ;;  %s219_s7 = scalar_select %p218_p10, %s1978_s22, 1  ;;  %566 = vst.msk [vmem:[#allocation2 + $0x30] sm:$0xff] %vm558_vm2, %v1923_v18  ;;  %567 = vst.msk [vmem:[#allocation2 + $0x38] sm:$0xff] %vm558_vm2, %v1923_v18  ;;  %v2101_v20 = vshrl.u32 %v681_v19, 7  ;;  %v2113_v24 = vld [vmem:[%s3140_s2] ss:$0 sm:$0xff] }
  0x16   : > { %559 = vst.msk [vmem:[#allocation2] sm:$0xff] %vm558_vm2, %v1923_v18  ;;  %560 = vst.msk [vmem:[#allocation2 + $0x8] sm:$0xff] %vm558_vm2, %v1923_v18  ;;  %s2363_s30 = sshll.u32 %s215_s23, 8  ;;  %s1865_s25 = sshll.u32 %s1924_s17, 4  ;;  %s1866_s25 = int_to_ptr.vmem [resolvable:$false] %s1865_s25 }
  0x17   : > { %s1744_s8 = sshll.u32 %s219_s7, 7  ;;  %563 = vst.msk [vmem:[#allocation2 + $0x18] sm:$0xff] %vm558_vm2, %v1923_v18  ;;  %564 = vst.msk [vmem:[#allocation2 + $0x20] sm:$0xff] %vm558_vm2, %v1923_v18  ;;  %v683_v21 = vsub.s32 0, %v2101_v20  ;;  %v751_v22 = vsub.s32 1, %v2101_v20  ;;  %v851_v28 = vsub.s32 2, %v2101_v20 }
  0x18   : > { %s2013_s11 = scalar_lea.vmem %s3138_s0, %s1744_s8  ;;  %569 = vst.msk [vmem:[#allocation2 + $0x48] sm:$0xff] %vm558_vm2, %v1923_v18  ;;  %570 = vst.msk [vmem:[#allocation2 + $0x50] sm:$0xff] %vm558_vm2, %v1923_v18  ;;  %v951_v37 = vsub.s32 3, %v2101_v20  ;;  %v1051_v38 = vsub.s32 4, %v2101_v20  ;;  %v1252_v46 = vsub.s32 6, %v2101_v20  ;;  %v1352_v52 = vsub.s32 7, %v2101_v20 }
  0x19   : > { %v1843_v2 = vld [vmem:[%s2013_s11] sm:$0xff]   ;;  %v1845_v4 = vld [vmem:[%s2013_s11 + $0x8] sm:$0xff]   ;;  %v1847_v6 = vld [vmem:[%s2013_s11 + $0x10] sm:$0xff]   ;;  %572 = vst.msk [vmem:[#allocation2 + $0x60] sm:$0xff] %vm558_vm2, %v1923_v18  ;;  %v2116_v26 = vrot.slane %v2108_v23, %v683_v21  ;;  %v2119_v27 = vrot.slane %v2108_v23, %v751_v22  ;;  %v2132_v43 = vrot.slane %v2108_v23, %v851_v28  ;;  %v1151_v62 = vsub.s32 5, %v2101_v20  ;;  %s2413_s6 = scalar_lea.vmem [#allocation3], %s2363_s30 }
  0x1a   : > { %v1844_v3 = vld [vmem:[%s2013_s11 + $0x40] sm:$0xff]   ;;  %1765 = vmatprep.mubr.msk.bf16.mxu0 %vm344_vm1, %v1843_v2  ;;  %v1846_v5 = vld [vmem:[%s2013_s11 + $0x48] sm:$0xff]   ;;  %v1848_v7 = vld [vmem:[%s2013_s11 + $0x50] sm:$0xff]   ;;  %573 = vst.msk [vmem:[#allocation2 + $0x68] sm:$0xff] %vm558_vm2, %v1923_v18  ;;  %v2144_v56 = vrot.slane %v2108_v23, %v951_v37  ;;  %v2147_v57 = vrot.slane %v2108_v23, %v1051_v38  ;;  %v2156_v1 = vrot.slane %v2108_v23, %v1252_v46  ;;  %s1635_s12 = sshll.u32 %s2413_s6, 4  ;;  %s1867_s26 = scalar_lea.vmem %s1866_s25, 8192  ;;  %s3088_s12 = int_to_ptr.vmem [resolvable:$true] %s1635_s12 }
  0x1b   : > { %1781 = vmatprep.mubr.msk.bf16.mxu1 %vm344_vm1, %v1844_v3  ;;  %1766 = vmatmul.mubr.msk.bf16.vlgmr.msra.gmra.mxu0 %vm344_vm1, %v1845_v4  ;;  %v1849_v8 = vld [vmem:[%s2013_s11 + $0x18] sm:$0xff]   ;;  %v1851_v10 = vld [vmem:[%s2013_s11 + $0x20] sm:$0xff]   ;;  %v1853_v12 = vld [vmem:[%s2013_s11 + $0x28] sm:$0xff]   ;;  %575 = vst.msk [vmem:[#allocation2 + $0x78] sm:$0xff] %vm558_vm2, %v1923_v18  ;;  %v2176_v21 = vrot.slane %v2108_v23, %v1151_v62  ;;  %s1861_s16 = scalar_lea.vmem %s3088_s12, 4096  ;;  %p1868_p0 = scmp.lt.s32.totalorder %s3088_s12, %s1866_s25 }
  0x1c   : > { %1782 = vmatmul.mubr.msk.bf16.vlgmr.msra.gmra.mxu1 %vm344_vm1, %v1846_v5  ;;  %1769 = vmatprep.mubr.msk.bf16.mxu0 %vm344_vm1, %v1847_v6  ;;  %v1850_v9 = vld [vmem:[%s2013_s11 + $0x58] sm:$0xff]   ;;  %v1852_v11 = vld [vmem:[%s2013_s11 + $0x60] sm:$0xff]   ;;  %v1854_v13 = vld [vmem:[%s2013_s11 + $0x68] sm:$0xff]   ;;  %576 = vst.msk [vmem:[#allocation2 + $0x80] sm:$0xff] %vm558_vm2, %v1923_v18  ;;  %p1862_p11 = scmp.ne.s32.totalorder %s3088_s12, %s1861_s16  ;;  %p1869_p1 = scmp.lt.s32.totalorder %s1867_s26, %s1861_s16 }
  0x1d   : > { %1785 = vmatprep.mubr.msk.bf16.mxu1 %vm344_vm1, %v1848_v7  ;;  %v1855_v14 = vld [vmem:[%s2013_s11 + $0x30] sm:$0xff]   ;;  %v1857_v16 = vld [vmem:[%s2013_s11 + $0x38] sm:$0xff]   ;;  %578 = vst.msk [vmem:[#allocation2 + $0x90] sm:$0xff] %vm558_vm2, %v1923_v18  ;;  %579 = vst.msk [vmem:[#allocation2 + $0x98] sm:$0xff] %vm558_vm2, %v1923_v18 }
  0x1e   : > { %v1856_v15 = vld [vmem:[%s2013_s11 + $0x70] sm:$0xff]   ;;  %v1858_v17 = vld [vmem:[%s2013_s11 + $0x78] sm:$0xff]   ;;  %581 = vst.msk [vmem:[#allocation2 + $0xa8] sm:$0xff] %vm558_vm2, %v1923_v18  ;;  %582 = vst.msk [vmem:[#allocation2 + $0xb0] sm:$0xff] %vm558_vm2, %v1923_v18  ;;  %s1745_s11 = sshll.u32 %s1978_s22, 12  ;;  %s3098_s22 = scalar_lea.sflag [#allocation4], %s215_s23 }
  0x1f   : > { %584 = vst.msk [vmem:[#allocation2 + $0xc0] sm:$0xff] %vm558_vm2, %v1923_v18  ;;  %585 = vst.msk [vmem:[#allocation2 + $0xc8] sm:$0xff] %vm558_vm2, %v1923_v18  ;;  %v649_v31 = vld [vmem:[#allocation2] sm:$0xff]  ;;  %v650_v35 = vld [vmem:[#allocation2 + $0x8] sm:$0xff]  ;;  %s3086_s15 = scalar_lea.hbm %s3143_s5, %s1745_s11  ;;  %p1863_p12 = pnand %p1862_p11, %p1995_p5 }
  0x20   : > { %587 = vst.msk [vmem:[#allocation2 + $0xd8] sm:$0xff] %vm558_vm2, %v1923_v18  ;;  %588 = vst.msk [vmem:[#allocation2 + $0xe0] sm:$0xff] %vm558_vm2, %v1923_v18  ;;  %v717_v32 = vld [vmem:[#allocation2 + $0x1] sm:$0xff]  ;;  %v685_v41 = vmul.f32 %v2116_v26, %v649_v31  ;;  %v686_v50 = vmul.f32 %v2116_v26, %v650_v35  ;;  %p1870_p2 = por %p1869_p1, %p1868_p0 }
  0x21   : > { %590 = vst.msk [vmem:[#allocation2 + $0xf0] sm:$0xff] %vm558_vm2, %v1923_v18  ;;  %591 = vst.msk [vmem:[#allocation2 + $0xf8] sm:$0xff] %vm558_vm2, %v1923_v18  ;;  %v753_v42 = vmul.f32 %v2119_v27, %v717_v32  ;;  %v817_v47 = vld [vmem:[#allocation2 + $0x2] sm:$0xff]  ;;  %p1864_p13 = pneg %p1863_p12 }
  0x22   : > { %593 = vst.msk [vmem:[#allocation2 + $0x108] sm:$0xff] %vm558_vm2, %v1923_v18  ;;  %594 = vst.msk [vmem:[#allocation2 + $0x110] sm:$0xff] %vm558_vm2, %v1923_v18  ;;  %v853_v61 = vmul.f32 %v2132_v43, %v817_v47 }
  0x23   : > { %1770 = vmatmul.mubr.msk.bf16.gmra.mxu0 %vm344_vm1, %v1849_v8  ;;  %596 = vst.msk [vmem:[#allocation2 + $0x120] sm:$0xff] %vm558_vm2, %v1923_v18  ;;  %597 = vst.msk [vmem:[#allocation2 + $0x128] sm:$0xff] %vm558_vm2, %v1923_v18  ;;  %v785_v60 = vadd.f32 %v753_v42, %v685_v41  ;;  %v2162_v8 = vrot.slane %v2108_v23, %v1352_v52  ;;  %p1871_p3 = pnand %p1870_p2, %p1864_p13 }
  0x24   : > { %1786 = vmatmul.mubr.msk.bf16.gmra.mxu1 %vm344_vm1, %v1850_v9  ;;  %1773 = vmatprep.mubr.msk.bf16.mxu0 %vm344_vm1, %v1851_v10  ;;  %599 = vst.msk [vmem:[#allocation2 + $0x138] sm:$0xff] %vm558_vm2, %v1923_v18  ;;  %600 = vst.msk [vmem:[#allocation2 + $0x140] sm:$0xff] %vm558_vm2, %v1923_v18 }
  0x25   : > { %1789 = vmatprep.mubr.msk.bf16.mxu1 %vm344_vm1, %v1852_v11  ;;  %602 = vst.msk [vmem:[#allocation2 + $0x150] sm:$0xff] %vm558_vm2, %v1923_v18  ;;  %603 = vst.msk [vmem:[#allocation2 + $0x158] sm:$0xff] %vm558_vm2, %v1923_v18  ;;  %v885_v20 = vadd.f32 %v853_v61, %v785_v60 }
  0x26   : > { %605 = vst.msk [vmem:[#allocation2 + $0x168] sm:$0xff] %vm558_vm2, %v1923_v18  ;;  %606 = vst.msk [vmem:[#allocation2 + $0x170] sm:$0xff] %vm558_vm2, %v1923_v18 }
  0x27   : > { %608 = vst.msk [vmem:[#allocation2 + $0x180] sm:$0xff] %vm558_vm2, %v1923_v18  ;;  %609 = vst.msk [vmem:[#allocation2 + $0x188] sm:$0xff] %vm558_vm2, %v1923_v18 }
  0x28   : > { %611 = vst.msk [vmem:[#allocation2 + $0x198] sm:$0xff] %vm558_vm2, %v1923_v18  ;;  %612 = vst.msk [vmem:[#allocation2 + $0x1a0] sm:$0xff] %vm558_vm2, %v1923_v18 }
  0x29   : > { %568 = vst.msk [vmem:[#allocation2 + $0x40] sm:$0x3] %vm561_vm3, %v1923_v18  ;;  %562 = vst.msk [vmem:[#allocation2 + $0x10] sm:$0x3] %vm561_vm3, %v1923_v18 }
  0x2a   : > { %565 = vst.msk [vmem:[#allocation2 + $0x28] sm:$0x3] %vm561_vm3, %v1923_v18  ;;  %571 = vst.msk [vmem:[#allocation2 + $0x58] sm:$0x3] %vm561_vm3, %v1923_v18 }
  0x2b   : > { %1774 = vmatmul.mubr.msk.bf16.gmra.mxu0 %vm344_vm1, %v1853_v12  ;;  %574 = vst.msk [vmem:[#allocation2 + $0x70] sm:$0x3] %vm561_vm3, %v1923_v18  ;;  %577 = vst.msk [vmem:[#allocation2 + $0x88] sm:$0x3] %vm561_vm3, %v1923_v18 }
  0x2c   : > { %1790 = vmatmul.mubr.msk.bf16.gmra.mxu1 %vm344_vm1, %v1854_v13  ;;  %1777 = vmatprep.mubr.msk.bf16.mxu0 %vm344_vm1, %v1855_v14  ;;  %580 = vst.msk [vmem:[#allocation2 + $0xa0] sm:$0x3] %vm561_vm3, %v1923_v18  ;;  %583 = vst.msk [vmem:[#allocation2 + $0xb8] sm:$0x3] %vm561_vm3, %v1923_v18 }
  0x2d   : > { %1793 = vmatprep.mubr.msk.bf16.mxu1 %vm344_vm1, %v1856_v15  ;;  %586 = vst.msk [vmem:[#allocation2 + $0xd0] sm:$0x3] %vm561_vm3, %v1923_v18  ;;  %589 = vst.msk [vmem:[#allocation2 + $0xe8] sm:$0x3] %vm561_vm3, %v1923_v18 }
  0x2e   : > { %592 = vst.msk [vmem:[#allocation2 + $0x100] sm:$0x3] %vm561_vm3, %v1923_v18  ;;  %595 = vst.msk [vmem:[#allocation2 + $0x118] sm:$0x3] %vm561_vm3, %v1923_v18 }
  0x2f   : > { %598 = vst.msk [vmem:[#allocation2 + $0x130] sm:$0x3] %vm561_vm3, %v1923_v18  ;;  %601 = vst.msk [vmem:[#allocation2 + $0x148] sm:$0x3] %vm561_vm3, %v1923_v18 }
  0x30   : > { %604 = vst.msk [vmem:[#allocation2 + $0x160] sm:$0x3] %vm561_vm3, %v1923_v18  ;;  %607 = vst.msk [vmem:[#allocation2 + $0x178] sm:$0x3] %vm561_vm3, %v1923_v18  ;;  %v718_v36 = vld [vmem:[#allocation2 + $0x9] sm:$0xff] }
  0x31   : > { %610 = vst.msk [vmem:[#allocation2 + $0x190] sm:$0x3] %vm561_vm3, %v1923_v18  ;;  %613 = vst.msk [vmem:[#allocation2 + $0x1a8] sm:$0x3] %vm561_vm3, %v1923_v18  ;;  %v754_v51 = vmul.f32 %v2119_v27, %v718_v36  ;;  %v818_v55 = vld [vmem:[#allocation2 + $0xa] sm:$0xff] }
  0x32   : > { %v854_v3 = vmul.f32 %v2132_v43, %v818_v55 }
  0x33   : > { %1778 = vmatmul.mubr.msk.bf16.gmra.mxu0 %vm344_vm1, %v1857_v16  ;;  %v786_v2 = vadd.f32 %v754_v51, %v686_v50 }
  0x34   : > { %1794 = vmatmul.mubr.msk.bf16.gmra.mxu1 %vm344_vm1, %v1858_v17 }
  0x35   : > { %v2190_v32 = vadd.f32 %v854_v3, %v786_v2 }
  0xdb   : > { %v1767_v25 = vpop.f32.mrf.mxu0 }
  0xdc   : > { %v440_v29 = vadd.f32 %v1767_v25, %v2113_v24  ;;  %v1783_v30 = vpop.f32.mrf.mxu1 }
  0xdd   : > { %v504_v33 = vadd.f32 %v1783_v30, %v2113_v24  ;;  %v431_v34 = vpop.f32.mrf.mxu0 }
  0xde   : > { %617 = vst.msk [vmem:[#allocation2 + $0x31] sm:$0xff] %vm558_vm2, %v440_v29  ;;  %v432_v39 = vadd.f32 %v2113_v24, %v431_v34  ;;  %v495_v40 = vpop.f32.mrf.mxu1 }
  0xdf   : > { %633 = vst.msk [vmem:[#allocation2 + $0xf1] sm:$0xff] %vm558_vm2, %v504_v33  ;;  %v496_v44 = vadd.f32 %v2113_v24, %v495_v40  ;;  %v1768_v45 = vpop.f32.mrf.mxu0 }
  0xe0   : > { %615 = vst.msk [vmem:[#allocation2 + $0x19] sm:$0xff] %vm558_vm2, %v432_v39  ;;  %v443_v48 = vadd.f32 %v1768_v45, %v2113_v24  ;;  %v1784_v49 = vpop.f32.mrf.mxu1 }
  0xe1   : > { %631 = vst.msk [vmem:[#allocation2 + $0xd9] sm:$0xff] %vm558_vm2, %v496_v44  ;;  %v507_v53 = vadd.f32 %v1784_v49, %v2113_v24  ;;  %v434_v54 = vpop.f32.mrf.mxu0 }
  0xe2   : > { %618 = vst.msk [vmem:[#allocation2 + $0x39] sm:$0xff] %vm558_vm2, %v443_v48  ;;  %v435_v58 = vadd.f32 %v2113_v24, %v434_v54  ;;  %v498_v59 = vpop.f32.mrf.mxu1 }
  0xe3   : > { %634 = vst.msk [vmem:[#allocation2 + $0xf9] sm:$0xff] %vm558_vm2, %v507_v53  ;;  %v499_v63 = vadd.f32 %v2113_v24, %v498_v59  ;;  %v1771_v0 = vpop.f32.mrf.mxu0 }
  0xe4   : > { %616 = vst.msk [vmem:[#allocation2 + $0x21] sm:$0xff] %vm558_vm2, %v435_v58  ;;  %v456_v4 = vadd.f32 %v1771_v0, %v2113_v24  ;;  %v1787_v5 = vpop.f32.mrf.mxu1 }
  0xe5   : > { %v653_v6 = vld [vmem:[#allocation2 + $0x30] sm:$0xff]  ;;  %632 = vst.msk [vmem:[#allocation2 + $0xe1] sm:$0xff] %vm558_vm2, %v499_v63  ;;  %v520_v9 = vadd.f32 %v1787_v5, %v2113_v24  ;;  %v2166_v10 = vpop.f32.mrf.mxu0 }
  0xe6   : > { %v721_v7 = vld [vmem:[#allocation2 + $0x31] sm:$0xff]  ;;  %v689_v11 = vmul.f32 %v2116_v26, %v653_v6  ;;  %621 = vst.msk [vmem:[#allocation2 + $0x61] sm:$0xff] %vm558_vm2, %v456_v4  ;;  %v2171_v15 = vpop.f32.mrf.mxu1  ;;  %v2182_v25 = vmul.f32 %v2144_v56, %v653_v6  ;;  %v2188_v29 = vmul.f32 %v2156_v1, %v653_v6 }
  0xe7   : > { %v757_v12 = vmul.f32 %v2119_v27, %v721_v7  ;;  %v669_v13 = vld [vmem:[#allocation2 + $0xf0] sm:$0xff]  ;;  %v651_v18 = vld [vmem:[#allocation2 + $0x18] sm:$0xff]  ;;  %637 = vst.msk [vmem:[#allocation2 + $0x121] sm:$0xff] %vm558_vm2, %v520_v9  ;;  %v2179_v22 = vpop.f32.mrf.mxu0  ;;  %v2185_v28 = vmul.f32 %v2147_v57, %v721_v7  ;;  %v2195_v34 = vmul.f32 %v2162_v8, %v721_v7 }
  0xe8   : > { %v737_v14 = vld [vmem:[#allocation2 + $0xf1] sm:$0xff]  ;;  %v705_v16 = vmul.f32 %v2116_v26, %v669_v13  ;;  %v719_v19 = vld [vmem:[#allocation2 + $0x19] sm:$0xff]  ;;  %v2192_v33 = vpop.f32.mrf.mxu1  ;;  %v687_v35 = vmul.f32 %v2116_v26, %v651_v18  ;;  %v2202_v39 = vmul.f32 %v2144_v56, %v669_v13  ;;  %v953_v40 = vmul.f32 %v2144_v56, %v651_v18 }
  0xe9   : > { %v773_v17 = vmul.f32 %v2119_v27, %v737_v14  ;;  %v667_v30 = vld [vmem:[#allocation2 + $0xd8] sm:$0xff]  ;;  %v789_v23 = vadd.f32 %v757_v12, %v689_v11  ;;  %v755_v36 = vmul.f32 %v2119_v27, %v719_v19  ;;  %v2199_v38 = vpop.f32.mrf.mxu0  ;;  %v2210_v48 = vmul.f32 %v2147_v57, %v737_v14  ;;  %v2244_v11 = vld [vmem:[%s3141_s3 + $0x8] ss:$0 sm:$0xff] }
  0xea   : > { %v735_v31 = vld [vmem:[#allocation2 + $0xd9] sm:$0xff]  ;;  %v703_v41 = vmul.f32 %v2116_v26, %v667_v30  ;;  %v2207_v46 = vpop.f32.mrf.mxu1  ;;  %v2213_v49 = vmul.f32 %v2156_v1, %v669_v13  ;;  %v2216_v50 = vmul.f32 %v2162_v8, %v737_v14  ;;  %v985_v54 = vadd.f32 %v953_v40, %v885_v20 }
  0xeb   : > { %v654_v37 = vld [vmem:[#allocation2 + $0x38] sm:$0xff]  ;;  %v771_v42 = vmul.f32 %v2119_v27, %v735_v31  ;;  %v805_v47 = vadd.f32 %v773_v17, %v705_v16  ;;  %v2218_v52 = vpop.f32.mrf.mxu0  ;;  %v787_v53 = vadd.f32 %v755_v36, %v687_v35  ;;  %v1053_v55 = vmul.f32 %v2147_v57, %v719_v19 }
  0xec   : > { %v722_v44 = vld [vmem:[#allocation2 + $0x39] sm:$0xff]  ;;  %3148 = vst [vmem:[#allocation6_spill] sm:$0xff] %v2213_v49  ;;  %3149 = vst [vmem:[#allocation7_spill] sm:$0xff] %v2216_v50  ;;  %v690_v58 = vmul.f32 %v2116_v26, %v654_v37  ;;  %v2222_v59 = vpop.f32.mrf.mxu1  ;;  %v2225_v60 = vmul.f32 %v2144_v56, %v667_v30  ;;  %v2228_v61 = vmul.f32 %v2147_v57, %v735_v31 }
  0xed   : > { %v821_v45 = vld [vmem:[#allocation2 + $0x32] sm:$0xff]  ;;  %v822_v51 = vld [vmem:[#allocation2 + $0x3a] sm:$0xff]  ;;  %v758_v62 = vmul.f32 %v2119_v27, %v722_v44  ;;  %v2232_v3 = vadd.f32 %v771_v42, %v703_v41  ;;  %v2235_v4 = vmul.f32 %v2156_v1, %v667_v30  ;;  %v2238_v5 = vmul.f32 %v2162_v8, %v735_v31  ;;  %v2252_v17 = vpop.f32.mrf.mxu0 }
  0xee   : > { %3150 = vst [vmem:[#allocation8_spill] sm:$0xff] %v2225_v60  ;;  %3151 = vst [vmem:[#allocation9_spill] sm:$0xff] %v2228_v61  ;;  %v857_v63 = vmul.f32 %v2132_v43, %v821_v45  ;;  %v670_v0 = vld [vmem:[#allocation2 + $0xf8] sm:$0xff]  ;;  %v858_v6 = vmul.f32 %v2132_v43, %v822_v51  ;;  %v1085_v9 = vadd.f32 %v1053_v55, %v985_v54  ;;  %v2254_v18 = vpop.f32.mrf.mxu1  ;;  %v652_v42 = vld [vmem:[#allocation2 + $0x20] sm:$0xff] }
  0xef   : > { %v738_v2 = vld [vmem:[#allocation2 + $0xf9] sm:$0xff]  ;;  %3152 = vst [vmem:[#allocation10_spill] sm:$0xff] %v2235_v4  ;;  %3153 = vst [vmem:[#allocation11_spill] sm:$0xff] %v2238_v5  ;;  %v790_v12 = vadd.f32 %v758_v62, %v690_v58  ;;  %v2247_v13 = vmul.f32 %v2144_v56, %v654_v37  ;;  %v2250_v14 = vmul.f32 %v2147_v57, %v722_v44  ;;  %v720_v54 = vld [vmem:[#allocation2 + $0x21] sm:$0xff] }
  0xf0   : > { %v837_v7 = vld [vmem:[#allocation2 + $0xf2] sm:$0xff]  ;;  %v838_v16 = vld [vmem:[#allocation2 + $0xfa] sm:$0xff]  ;;  %3154 = vst [vmem:[#allocation12_spill] sm:$0xff] %v2252_v17  ;;  %3155 = vst [vmem:[#allocation13_spill] sm:$0xff] %v2254_v18  ;;  %v2257_v19 = vmul.f32 %v2176_v21, %v821_v45  ;;  %v2260_v20 = vmul.f32 %v2176_v21, %v822_v51  ;;  %v706_v30 = vmul.f32 %v2116_v26, %v670_v0  ;;  %v2293_v50 = vpop.f32.mrf.mxu1 }
  0xf1   : > { %v774_v31 = vmul.f32 %v2119_v27, %v738_v2  ;;  %v2264_v35 = vadd.f32 %v857_v63, %v789_v23  ;;  %v2267_v36 = vmul.f32 %v2156_v1, %v654_v37  ;;  %v2270_v40 = vmul.f32 %v2162_v8, %v722_v44  ;;  %v819_v63 = vld [vmem:[#allocation2 + $0x1a] sm:$0xff]  ;;  %v820_v37 = vld [vmem:[#allocation2 + $0x22] sm:$0xff]  ;;  %3163 = vst [vmem:[#allocation21_spill] sm:$0xff] %v2293_v50 }
  0xf2   : > { %3156 = vst [vmem:[#allocation14_spill] sm:$0xff] %v2257_v19  ;;  %3157 = vst [vmem:[#allocation15_spill] sm:$0xff] %v2260_v20  ;;  %v873_v41 = vmul.f32 %v2132_v43, %v837_v7  ;;  %v2273_v55 = vadd.f32 %v858_v6, %v790_v12  ;;  %v2276_v58 = vmul.f32 %v2244_v11, %v821_v45  ;;  %v668_v12 = vld [vmem:[#allocation2 + $0xe0] sm:$0xff]  ;;  %v2291_v45 = vpop.f32.mrf.mxu0 }
  0xf3   : > { %3158 = vst [vmem:[#allocation16_spill] sm:$0xff] %v2264_v35  ;;  %v2279_v62 = vmul.f32 %v2244_v11, %v822_v51  ;;  %v874_v23 = vmul.f32 %v2132_v43, %v838_v16  ;;  %v806_v5 = vadd.f32 %v774_v31, %v706_v30  ;;  %v2283_v44 = vmul.f32 %v2144_v56, %v670_v0  ;;  %v736_v61 = vld [vmem:[#allocation2 + $0xe1] sm:$0xff] }
  0xf4   : > { %3159 = vst [vmem:[#allocation17_spill] sm:$0xff] %v2273_v55  ;;  %v2286_v4 = vmul.f32 %v2147_v57, %v738_v2  ;;  %v2289_v6 = vmul.f32 %v2176_v21, %v837_v7  ;;  %3162 = vst [vmem:[#allocation20_spill] sm:$0xff] %v2291_v45  ;;  %v2295_v51 = vadd.f32 %v873_v41, %v805_v47  ;;  %v835_v60 = vld [vmem:[#allocation2 + $0xda] sm:$0xff]  ;;  %v836_v19 = vld [vmem:[#allocation2 + $0xe2] sm:$0xff]  ;;  %v2314_v18 = vpop.f32.mrf.mxu0 }
  0xf5   : > { %v2298_v49 = vmul.f32 %v2176_v21, %v838_v16  ;;  %v688_v30 = vmul.f32 %v2116_v26, %v652_v42  ;;  %v756_v31 = vmul.f32 %v2119_v27, %v720_v54  ;;  %v2303_v55 = vmul.f32 %v2156_v1, %v670_v0 }
  0xf6   : > { %3160 = vst [vmem:[#allocation18_spill] sm:$0xff] %v2286_v4  ;;  %3161 = vst [vmem:[#allocation19_spill] sm:$0xff] %v2289_v6  ;;  %v855_v35 = vmul.f32 %v2132_v43, %v819_v63  ;;  %v856_v20 = vmul.f32 %v2132_v43, %v820_v37  ;;  %v954_v6 = vmul.f32 %v2144_v56, %v652_v42  ;;  %v2316_v4 = vpop.f32.mrf.mxu1 }
  0xf7   : > { %3164 = vst [vmem:[#allocation22_spill] sm:$0xff] %v2295_v51  ;;  %3165 = vst [vmem:[#allocation23_spill] sm:$0xff] %v2298_v49  ;;  %v788_v47 = vadd.f32 %v756_v31, %v688_v30  ;;  %v1054_v41 = vmul.f32 %v2147_v57, %v720_v54  ;;  %v1153_v51 = vmul.f32 %v2176_v21, %v819_v63 }
  0xf8   : > { %3166 = vst [vmem:[#allocation24_spill] sm:$0xff] %v2303_v55  ;;  %v704_v49 = vmul.f32 %v2116_v26, %v668_v12  ;;  %v887_v50 = vadd.f32 %v855_v35, %v787_v53  ;;  %v986_v45 = vadd.f32 %v954_v6, %v2190_v32  ;;  %v772_v0 = vmul.f32 %v2119_v27, %v736_v61 }
  0xf9   : > { %v871_v55 = vmul.f32 %v2132_v43, %v835_v60  ;;  %3167 = vst [vmem:[#allocation25_spill] sm:$0xff] %v2316_v4  ;;  %v2319_v42 = vmul.f32 %v2162_v8, %v738_v2  ;;  %v888_v54 = vadd.f32 %v856_v20, %v788_v47  ;;  %v1154_v63 = vmul.f32 %v2176_v21, %v820_v37  ;;  %v657_v20 = vld [vmem:[#allocation2 + $0x60] sm:$0xff] }
  0xfa   : > { %v1185_v30 = vadd.f32 %v1153_v51, %v1085_v9  ;;  %v1086_v31 = vadd.f32 %v1054_v41, %v986_v45  ;;  %v804_v53 = vadd.f32 %v772_v0, %v704_v49  ;;  %v872_v32 = vmul.f32 %v2132_v43, %v836_v19 }
  0xfb   : > { %3168 = vst [vmem:[#allocation26_spill] sm:$0xff] %v2319_v42  ;;  %v903_v35 = vadd.f32 %v871_v55, %v2232_v3  ;;  %v2324_v6 = vadd.f32 %v874_v23, %v806_v5  ;;  %v2327_v17 = vmul.f32 %v2244_v11, %v837_v7  ;;  %v2330_v4 = vmul.f32 %v2244_v11, %v838_v16  ;;  %v725_v3 = vld [vmem:[#allocation2 + $0x61] sm:$0xff]  ;;  %v2338_v5 = vpop.f32.mrf.mxu0  ;;  %v2340_v7 = vpop.f32.mrf.mxu1  ;;  %v2354_v23 = vld [vmem:[%s3142_s4] ss:$0 sm:$0xff] }
  0xfc   : > { %v1286_v2 = vadd.f32 %v2188_v29, %v1185_v30  ;;  %v987_v9 = vadd.f32 %v2182_v25, %v887_v50  ;;  %v1186_v49 = vadd.f32 %v1154_v63, %v1086_v31  ;;  %v904_v37 = vadd.f32 %v872_v32, %v804_v53 }
  0xfd   : > { %3169 = vst [vmem:[#allocation27_spill] sm:$0xff] %v2327_v17  ;;  %3170 = vst [vmem:[#allocation28_spill] sm:$0xff] %v2330_v4  ;;  %v2336_v45 = vmul.f32 %v2144_v56, %v668_v12  ;;  %v988_v16 = vadd.f32 %v2247_v13, %v888_v54  ;;  %v2345_v29 = vmul.f32 %v2147_v57, %v736_v61  ;;  %v673_v54 = vld [vmem:[#allocation2 + $0x120] sm:$0xff]  ;;  %v479_v53 = vpop.f32.mrf.mxu0 }
  0xfe   : > { %v1386_v55 = vadd.f32 %v2195_v34, %v1286_v2  ;;  %v2348_v25 = vmul.f32 %v2176_v21, %v835_v60  ;;  %v1287_v50 = vadd.f32 %v2267_v36, %v1186_v49  ;;  %v1003_v51 = vadd.f32 %v2202_v39, %v903_v35 }
  0xff   : > { %3171 = vst [vmem:[#allocation29_spill] sm:$0xff] %v2336_v45  ;;  %3172 = vst [vmem:[#allocation30_spill] sm:$0xff] %v2345_v29  ;;  %v2358_v47 = vmul.f32 %v2176_v21, %v836_v19  ;;  %v693_v34 = vmul.f32 %v2116_v26, %v657_v20  ;;  %v2367_v41 = vmul.f32 %v2156_v1, %v668_v12  ;;  %v543_v12 = vpop.f32.mrf.mxu1 }
 0x100   : > { %3173 = vst [vmem:[#allocation31_spill] sm:$0xff] %v2348_v25  ;;  %v1486_v13 = vadd.f32 %v2276_v58, %v1386_v55  ;;  %v2370_v36 = vmul.f32 %v2162_v8, %v736_v61  ;;  %v761_v0 = vmul.f32 %v2119_v27, %v725_v3  ;;  %v1387_v39 = vadd.f32 %v2270_v40, %v1287_v50  ;;  %v741_v58 = vld [vmem:[#allocation2 + $0x121] sm:$0xff] }
 0x101   : > { %3174 = vst [vmem:[#allocation32_spill] sm:$0xff] %v2358_v47  ;;  %3175 = vst [vmem:[#allocation33_spill] sm:$0xff] %v2367_v41  ;;  %v1004_v63 = vadd.f32 %v2283_v44, %v904_v37  ;;  %v2376_v30 = vmul.f32 %v2244_v11, %v835_v60  ;;  %v2379_v31 = vmul.f32 %v2244_v11, %v836_v19 }
 0x102   : > { %3176 = vst [vmem:[#allocation34_spill] sm:$0xff] %v2370_v36  ;;  %v1525_v32 = vadd.f32 %v2354_v23, %v1486_v13  ;;  %v2383_v61 = vmul.f32 %v2144_v56, %v657_v20  ;;  %v2386_v35 = vmul.f32 %v2147_v57, %v725_v3  ;;  %v2389_v40 = vmul.f32 %v2156_v1, %v657_v20  ;;  %v1780_v13 = vpop.f32.mrf.mxu0 }
 0x103   : > { %3177 = vst [vmem:[#allocation35_spill] sm:$0xff] %v2376_v30  ;;  %3178 = vst [vmem:[#allocation36_spill] sm:$0xff] %v2379_v31  ;;  %v1487_v60 = vadd.f32 %v2279_v62, %v1387_v39  ;;  %v2392_v44 = vadd.f32 %v761_v0, %v693_v34  ;;  %v2395_v19 = vmul.f32 %v2162_v8, %v725_v3  ;;  %v1796_v0 = vpop.f32.mrf.mxu1 }
 0x104   : > { %v709_v2 = vmul.f32 %v2116_v26, %v673_v54  ;;  %v1557_v49 = vmax.f32 %v1525_v32, 0.0  ;;  %v777_v37 = vmul.f32 %v2119_v27, %v741_v58  ;;  %v2400_v55 = vmul.f32 %v2144_v56, %v673_v54 }
 0x105   : > { %v448_v50 = vadd.f32 %v2113_v24, %v2166_v10  ;;  %v1526_v20 = vadd.f32 %v2354_v23, %v1487_v60  ;;  %v2406_v62 = vmul.f32 %v2147_v57, %v741_v58  ;;  %v512_v3 = vadd.f32 %v2113_v24, %v2171_v15 }
 0x106   : > { %v459_v34 = vadd.f32 %v2179_v22, %v2113_v24  ;;  %1589 = vst.msk [vmem:[%s2413_s6] sm:$0xff] %vm558_vm2, %v1557_v49  ;;  %v2418_v10 = vmul.f32 %v2156_v1, %v673_v54  ;;  %v2421_v39 = vmul.f32 %v2162_v8, %v741_v58  ;;  %v523_v15 = vadd.f32 %v2192_v33, %v2113_v24  ;;  %v3182_v49 = vld [vmem:[#allocation13_spill] sm:$0xff] }
 0x107   : > { %3179 = vst [vmem:[#allocation37_spill] sm:$0xff] %v2406_v62  ;;  %619 = vst.msk [vmem:[#allocation2 + $0x49] sm:$0xff] %vm558_vm2, %v448_v50  ;;  %v451_v22 = vadd.f32 %v2113_v24, %v2199_v38  ;;  %v1558_v32 = vmax.f32 %v1526_v20, 0.0  ;;  %v1087_v60 = vadd.f32 %v2185_v28, %v987_v9  ;;  %v1103_v54 = vadd.f32 %v2210_v48, %v1003_v51  ;;  %v3180_v9 = vld [vmem:[#allocation12_spill] sm:$0xff] }
 0x108   : > { %635 = vst.msk [vmem:[#allocation2 + $0x109] sm:$0xff] %vm558_vm2, %v512_v3  ;;  %622 = vst.msk [vmem:[#allocation2 + $0x69] sm:$0xff] %vm558_vm2, %v459_v34  ;;  %v515_v58 = vadd.f32 %v2113_v24, %v2207_v46  ;;  %v1088_v33 = vadd.f32 %v2250_v14, %v988_v16  ;;  %v472_v38 = vadd.f32 %v2218_v52, %v2113_v24  ;;  %v3181_v46 = vld [vmem:[#allocation18_spill] sm:$0xff]  ;;  %v3183_v14 = vld [vmem:[#allocation20_spill] sm:$0xff]  ;;  %v482_v3 = vpop.f32.mrf.mxu0 }
 0x109   : > { %638 = vst.msk [vmem:[#allocation2 + $0x129] sm:$0xff] %vm558_vm2, %v523_v15  ;;  %620 = vst.msk [vmem:[#allocation2 + $0x51] sm:$0xff] %vm558_vm2, %v451_v22  ;;  %v536_v28 = vadd.f32 %v2222_v59, %v2113_v24  ;;  %v464_v48 = vadd.f32 %v2113_v24, %v3180_v9  ;;  %v1104_v51 = vadd.f32 %v3181_v46, %v1004_v63  ;;  %v3184_v52 = vld [vmem:[#allocation21_spill] sm:$0xff]  ;;  %v546_v59 = vpop.f32.mrf.mxu1  ;;  %v3186_v46 = vld [vmem:[#allocation14_spill] sm:$0xff] }
 0x10a   : > { %1590 = vst.msk [vmem:[%s2413_s6 + $0x8] sm:$0xff] %vm558_vm2, %v1558_v32  ;;  %636 = vst.msk [vmem:[#allocation2 + $0x111] sm:$0xff] %vm558_vm2, %v515_v58  ;;  %v528_v50 = vadd.f32 %v2113_v24, %v3182_v49  ;;  %v475_v16 = vadd.f32 %v3183_v14, %v2113_v24  ;;  %v539_v20 = vadd.f32 %v3184_v52, %v2113_v24  ;;  %v3185_v34 = vld [vmem:[#allocation25_spill] sm:$0xff]  ;;  %v1248_v58 = vld [vmem:[#allocation2 + $0x198] sm:$0xff] }
 0x10b   : > { %625 = vst.msk [vmem:[#allocation2 + $0x91] sm:$0xff] %vm558_vm2, %v472_v38  ;;  %641 = vst.msk [vmem:[#allocation2 + $0x151] sm:$0xff] %vm558_vm2, %v536_v28  ;;  %v467_v63 = vadd.f32 %v2113_v24, %v2314_v18  ;;  %v531_v15 = vadd.f32 %v2113_v24, %v3185_v34  ;;  %v488_v22 = vadd.f32 %v2338_v5, %v2113_v24  ;;  %v1349_v49 = vld [vmem:[#allocation2 + $0x1a1] sm:$0xff]  ;;  %v3188_v14 = vld [vmem:[#allocation15_spill] sm:$0xff] }
 0x10c   : > { %623 = vst.msk [vmem:[#allocation2 + $0x79] sm:$0xff] %vm558_vm2, %v464_v48  ;;  %v552_v32 = vadd.f32 %v2340_v7, %v2113_v24  ;;  %639 = vst.msk [vmem:[#allocation2 + $0x139] sm:$0xff] %vm558_vm2, %v528_v50  ;;  %v480_v38 = vadd.f32 %v2113_v24, %v479_v53  ;;  %v544_v18 = vadd.f32 %v2113_v24, %v543_v12  ;;  %v1249_v48 = vld [vmem:[#allocation2 + $0x1a0] sm:$0xff] }
 0x10d   : > { %626 = vst.msk [vmem:[#allocation2 + $0x99] sm:$0xff] %vm558_vm2, %v475_v16  ;;  %642 = vst.msk [vmem:[#allocation2 + $0x159] sm:$0xff] %vm558_vm2, %v539_v20  ;;  %v491_v28 = vadd.f32 %v1780_v13, %v2113_v24  ;;  %v555_v9 = vadd.f32 %v1796_v0, %v2113_v24  ;;  %v2471_v5 = vadd.f32 %v777_v37, %v709_v2  ;;  %v1348_v13 = vld [vmem:[#allocation2 + $0x199] sm:$0xff] }
 0x10e   : > { %v1187_v7 = vadd.f32 %v3186_v46, %v1087_v60  ;;  %624 = vst.msk [vmem:[#allocation2 + $0x81] sm:$0xff] %vm558_vm2, %v467_v63  ;;  %640 = vst.msk [vmem:[#allocation2 + $0x141] sm:$0xff] %vm558_vm2, %v531_v15  ;;  %v483_v53 = vadd.f32 %v2113_v24, %v482_v3  ;;  %v547_v12 = vadd.f32 %v2113_v24, %v546_v59  ;;  %v655_v0 = vld [vmem:[#allocation2 + $0x48] sm:$0xff]  ;;  %v3187_v2 = vld [vmem:[#allocation19_spill] sm:$0xff] }
 0x10f   : > { %629 = vst.msk [vmem:[#allocation2 + $0xc1] sm:$0xff] %vm558_vm2, %v488_v22  ;;  %645 = vst.msk [vmem:[#allocation2 + $0x181] sm:$0xff] %vm558_vm2, %v552_v32  ;;  %v723_v50 = vld [vmem:[#allocation2 + $0x49] sm:$0xff]  ;;  %v1203_v37 = vadd.f32 %v3187_v2, %v1103_v54  ;;  %v2482_v60 = vadd.f32 %v3188_v14, %v1088_v33  ;;  %v3189_v16 = vld [vmem:[#allocation23_spill] sm:$0xff]  ;;  %v2492_v24 = vmul.f32 %v2156_v1, %v1248_v58 }
 0x110   : > { %v2485_v52 = vadd.f32 %v3189_v16, %v1104_v51  ;;  %627 = vst.msk [vmem:[#allocation2 + $0xa9] sm:$0xff] %vm558_vm2, %v480_v38  ;;  %643 = vst.msk [vmem:[#allocation2 + $0x169] sm:$0xff] %vm558_vm2, %v544_v18  ;;  %v1448_v20 = vld [vmem:[#allocation2 + $0x19a] sm:$0xff]  ;;  %v691_v54 = vmul.f32 %v2116_v26, %v655_v0  ;;  %v759_v33 = vmul.f32 %v2119_v27, %v723_v50  ;;  %v671_v51 = vld [vmem:[#allocation2 + $0x108] sm:$0xff] }
 0x111   : > { %630 = vst.msk [vmem:[#allocation2 + $0xc9] sm:$0xff] %vm558_vm2, %v491_v28  ;;  %646 = vst.msk [vmem:[#allocation2 + $0x189] sm:$0xff] %vm558_vm2, %v555_v9  ;;  %v957_v3 = vmul.f32 %v2144_v56, %v655_v0  ;;  %v739_v59 = vld [vmem:[#allocation2 + $0x109] sm:$0xff]  ;;  %v2500_v63 = vmul.f32 %v2156_v1, %v1249_v48  ;;  %v1256_v34 = vmul.f32 %v2156_v1, %v655_v0  ;;  %v3193_v18 = vld [vmem:[#allocation16_spill] sm:$0xff] }
 0x112   : > { %3190 = vst [vmem:[#allocation12_spill] sm:$0xff] %v2492_v24  ;;  %628 = vst.msk [vmem:[#allocation2 + $0xb1] sm:$0xff] %vm558_vm2, %v483_v53  ;;  %v707_v15 = vmul.f32 %v2116_v26, %v671_v51  ;;  %v775_v22 = vmul.f32 %v2119_v27, %v739_v59  ;;  %v658_v32 = vld [vmem:[#allocation2 + $0x68] sm:$0xff]  ;;  %v2506_v38 = vmul.f32 %v2162_v8, %v1348_v13  ;;  %v3196_v16 = vld [vmem:[#allocation22_spill] sm:$0xff] }
 0x113   : > { %644 = vst.msk [vmem:[#allocation2 + $0x171] sm:$0xff] %vm558_vm2, %v547_v12  ;;  %3191 = vst [vmem:[#allocation18_spill] sm:$0xff] %v2500_v63  ;;  %v726_v58 = vld [vmem:[#allocation2 + $0x69] sm:$0xff]  ;;  %v989_v28 = vadd.f32 %v957_v3, %v3193_v18  ;;  %v973_v9 = vmul.f32 %v2144_v56, %v671_v51  ;;  %v2511_v53 = vmul.f32 %v2162_v8, %v1349_v49  ;;  %v824_v41 = vld [vmem:[#allocation2 + $0x52] sm:$0xff] }
 0x114   : > { %3192 = vst [vmem:[#allocation13_spill] sm:$0xff] %v2506_v38  ;;  %v825_v46 = vld [vmem:[#allocation2 + $0x62] sm:$0xff]  ;;  %v2514_v48 = vmul.f32 %v2244_v11, %v1448_v20  ;;  %v1057_v12 = vmul.f32 %v2147_v57, %v723_v50  ;;  %v1288_v0 = vadd.f32 %v1256_v34, %v1187_v7  ;;  %v1356_v2 = vmul.f32 %v2162_v8, %v723_v50  ;;  %v826_v49 = vld [vmem:[#allocation2 + $0x6a] sm:$0xff] }
 0x115   : > { %3194 = vst [vmem:[#allocation20_spill] sm:$0xff] %v2511_v53  ;;  %v1272_v14 = vmul.f32 %v2156_v1, %v671_v51  ;;  %v2519_v13 = vadd.f32 %v759_v33, %v691_v54  ;;  %v1005_v3 = vadd.f32 %v973_v9, %v3196_v16  ;;  %v694_v18 = vmul.f32 %v2116_v26, %v658_v32  ;;  %v674_v33 = vld [vmem:[#allocation2 + $0x128] sm:$0xff]  ;;  %v672_v25 = vld [vmem:[#allocation2 + $0x110] sm:$0xff] }
 0x116   : > { %3195 = vst [vmem:[#allocation21_spill] sm:$0xff] %v2514_v48  ;;  %v762_v38 = vmul.f32 %v2119_v27, %v726_v58  ;;  %v2524_v53 = vadd.f32 %v775_v22, %v707_v15  ;;  %v1073_v20 = vmul.f32 %v2147_v57, %v739_v59  ;;  %v861_v7 = vmul.f32 %v2132_v43, %v825_v46  ;;  %v742_v63 = vld [vmem:[#allocation2 + $0x129] sm:$0xff] }
 0x117   : > { %v1304_v48 = vadd.f32 %v1272_v14, %v1203_v37  ;;  %v1089_v34 = vadd.f32 %v1057_v12, %v989_v28  ;;  %v1388_v50 = vadd.f32 %v1356_v2, %v1288_v0  ;;  %v1372_v51 = vmul.f32 %v2162_v8, %v739_v59  ;;  %v841_v9 = vld [vmem:[#allocation2 + $0x122] sm:$0xff]  ;;  %v842_v12 = vld [vmem:[#allocation2 + $0x12a] sm:$0xff] }
 0x118   : > { %v794_v54 = vadd.f32 %v762_v38, %v694_v18  ;;  %v2529_v16 = vadd.f32 %v1073_v20, %v1005_v3  ;;  %v862_v24 = vmul.f32 %v2132_v43, %v826_v49  ;;  %v2533_v15 = vmul.f32 %v2144_v56, %v658_v32  ;;  %v823_v31 = vld [vmem:[#allocation2 + $0x4a] sm:$0xff] }
 0x119   : > { %v2536_v22 = vmul.f32 %v2147_v57, %v726_v58  ;;  %v2538_v37 = vadd.f32 %v1372_v51, %v1304_v48  ;;  %v2541_v28 = vadd.f32 %v861_v7, %v2392_v44  ;;  %v2544_v59 = vmul.f32 %v2176_v21, %v825_v46  ;;  %v656_v48 = vld [vmem:[#allocation2 + $0x50] sm:$0xff] }
 0x11a   : > { %v2547_v38 = vmul.f32 %v2176_v21, %v826_v49  ;;  %v2549_v0 = vadd.f32 %v862_v24, %v794_v54  ;;  %v710_v2 = vmul.f32 %v2116_v26, %v674_v33  ;;  %v778_v14 = vmul.f32 %v2119_v27, %v742_v63  ;;  %v724_v51 = vld [vmem:[#allocation2 + $0x51] sm:$0xff] }
 0x11b   : > { %3197 = vst [vmem:[#allocation25_spill] sm:$0xff] %v2536_v22  ;;  %3198 = vst [vmem:[#allocation14_spill] sm:$0xff] %v2541_v28  ;;  %v877_v3 = vmul.f32 %v2132_v43, %v841_v9  ;;  %v1259_v18 = vmul.f32 %v2156_v1, %v658_v32  ;;  %v1359_v44 = vmul.f32 %v2162_v8, %v726_v58 }
 0x11c   : > { %3199 = vst [vmem:[#allocation19_spill] sm:$0xff] %v2544_v59  ;;  %3200 = vst [vmem:[#allocation15_spill] sm:$0xff] %v2547_v38  ;;  %v1458_v20 = vmul.f32 %v2244_v11, %v825_v46  ;;  %v2558_v7 = vmul.f32 %v2244_v11, %v826_v49  ;;  %v878_v24 = vmul.f32 %v2132_v43, %v842_v12 }
 0x11d   : > { %3201 = vst [vmem:[#allocation23_spill] sm:$0xff] %v2549_v0  ;;  %v2562_v54 = vmul.f32 %v2144_v56, %v674_v33  ;;  %v2565_v30 = vmul.f32 %v2147_v57, %v742_v63  ;;  %v2568_v36 = vmul.f32 %v2176_v21, %v841_v9  ;;  %v810_v32 = vadd.f32 %v778_v14, %v710_v2 }
 0x11e   : > { %v2571_v58 = vadd.f32 %v877_v3, %v2471_v5  ;;  %v2574_v46 = vmul.f32 %v2176_v21, %v842_v12  ;;  %v692_v49 = vmul.f32 %v2116_v26, %v656_v48  ;;  %v2578_v4 = vmul.f32 %v2156_v1, %v674_v33 }
 0x11f   : > { %3202 = vst [vmem:[#allocation16_spill] sm:$0xff] %v2565_v30  ;;  %3203 = vst [vmem:[#allocation22_spill] sm:$0xff] %v2568_v36  ;;  %v2581_v17 = vmul.f32 %v2162_v8, %v742_v63  ;;  %v760_v42 = vmul.f32 %v2119_v27, %v724_v51  ;;  %v859_v47 = vmul.f32 %v2132_v43, %v823_v31  ;;  %v3206_v30 = vld [vmem:[#allocation17_spill] sm:$0xff] }
 0x120   : > { %3204 = vst [vmem:[#allocation38_spill] sm:$0xff] %v2571_v58  ;;  %3205 = vst [vmem:[#allocation39_spill] sm:$0xff] %v2574_v46  ;;  %v2586_v2 = vmul.f32 %v2244_v11, %v841_v9  ;;  %v2589_v5 = vmul.f32 %v2244_v11, %v842_v12  ;;  %v958_v14 = vmul.f32 %v2144_v56, %v656_v48  ;;  %v740_v46 = vld [vmem:[#allocation2 + $0x111] sm:$0xff] }
 0x121   : > { %v1157_v3 = vmul.f32 %v2176_v21, %v823_v31  ;;  %v792_v33 = vadd.f32 %v760_v42, %v692_v49  ;;  %v860_v29 = vmul.f32 %v2132_v43, %v824_v41  ;;  %v1058_v63 = vmul.f32 %v2147_v57, %v724_v51  ;;  %v839_v58 = vld [vmem:[#allocation2 + $0x10a] sm:$0xff] }
 0x122   : > { %v1257_v45 = vmul.f32 %v2156_v1, %v656_v48  ;;  %v990_v38 = vadd.f32 %v958_v14, %v3206_v30  ;;  %v1158_v9 = vmul.f32 %v2176_v21, %v824_v41  ;;  %v1456_v12 = vmul.f32 %v2244_v11, %v823_v31  ;;  %v840_v14 = vld [vmem:[#allocation2 + $0x112] sm:$0xff] }
 0x123   : > { %v1189_v0 = vadd.f32 %v1157_v3, %v1089_v34  ;;  %v891_v22 = vadd.f32 %v859_v47, %v2519_v13  ;;  %v1357_v42 = vmul.f32 %v2162_v8, %v724_v51  ;;  %v708_v49 = vmul.f32 %v2116_v26, %v672_v25 }
 0x124   : > { %v1289_v36 = vadd.f32 %v1257_v45, %v2482_v60  ;;  %v1090_v62 = vadd.f32 %v1058_v63, %v990_v38  ;;  %v1488_v59 = vadd.f32 %v1456_v12, %v1388_v50  ;;  %v776_v30 = vmul.f32 %v2119_v27, %v740_v46 }
 0x125   : > { %v1290_v48 = vadd.f32 %v2389_v40, %v1189_v0  ;;  %v2605_v28 = vadd.f32 %v878_v24, %v810_v32  ;;  %v892_v34 = vadd.f32 %v860_v29, %v792_v33  ;;  %v1457_v47 = vmul.f32 %v2244_v11, %v824_v41 }
 0x126   : > { %v1389_v31 = vadd.f32 %v1357_v42, %v1289_v36  ;;  %v1190_v13 = vadd.f32 %v1158_v9, %v1090_v62  ;;  %v1527_v60 = vadd.f32 %v2354_v23, %v1488_v59  ;;  %v875_v38 = vmul.f32 %v2132_v43, %v839_v58  ;;  %v661_v9 = vld [vmem:[#allocation2 + $0x90] sm:$0xff] }
 0x127   : > { %v1390_v45 = vadd.f32 %v2395_v19, %v1290_v48  ;;  %v2612_v40 = vadd.f32 %v2383_v61, %v891_v22  ;;  %v876_v0 = vmul.f32 %v2132_v43, %v840_v14  ;;  %v974_v51 = vmul.f32 %v2144_v56, %v672_v25  ;;  %v729_v48 = vld [vmem:[#allocation2 + $0x91] sm:$0xff] }
 0x128   : > { %v1489_v50 = vadd.f32 %v1457_v47, %v1389_v31  ;;  %v1291_v29 = vadd.f32 %v1259_v18, %v1190_v13  ;;  %v1559_v24 = vmax.f32 %v1527_v60, 0.0  ;;  %v808_v41 = vadd.f32 %v776_v30, %v708_v49  ;;  %v677_v60 = vld [vmem:[#allocation2 + $0x150] sm:$0xff] }
 0x129   : > { %v1490_v36 = vadd.f32 %v1458_v20, %v1390_v45  ;;  %v1006_v19 = vadd.f32 %v974_v51, %v2324_v6  ;;  %v1074_v59 = vmul.f32 %v2147_v57, %v740_v46  ;;  %v1173_v32 = vmul.f32 %v2176_v21, %v839_v58 }
 0x12a   : > { %v1528_v62 = vadd.f32 %v2354_v23, %v1489_v50  ;;  %v1391_v61 = vadd.f32 %v1359_v44, %v1291_v29  ;;  %1591 = vst.msk [vmem:[%s2413_s6 + $0x10] sm:$0xff] %vm558_vm2, %v1559_v24  ;;  %v907_v3 = vadd.f32 %v875_v38, %v2524_v53  ;;  %v1174_v18 = vmul.f32 %v2176_v21, %v840_v14 }
 0x12b   : > { %v1529_v22 = vadd.f32 %v2354_v23, %v1490_v36  ;;  %v1106_v33 = vadd.f32 %v1074_v59, %v1006_v19  ;;  %v1205_v63 = vadd.f32 %v1173_v32, %v2529_v16  ;;  %v1273_v6 = vmul.f32 %v2156_v1, %v672_v25 }
 0x12c   : > { %v1560_v20 = vmax.f32 %v1528_v62, 0.0  ;;  %v1491_v12 = vadd.f32 %v2558_v7, %v1391_v61  ;;  %v908_v44 = vadd.f32 %v876_v0, %v808_v41  ;;  %v1472_v49 = vmul.f32 %v2244_v11, %v839_v58  ;;  %v659_v41 = vld [vmem:[#allocation2 + $0x78] sm:$0xff] }
 0x12d   : > { %v1561_v42 = vmax.f32 %v1529_v22, 0.0  ;;  %v1206_v53 = vadd.f32 %v1174_v18, %v1106_v33  ;;  %v1305_v30 = vadd.f32 %v1273_v6, %v2485_v52  ;;  %v1306_v31 = vadd.f32 %v2418_v10, %v1205_v63  ;;  %v727_v62 = vld [vmem:[#allocation2 + $0x79] sm:$0xff] }
 0x12e   : > { %1592 = vst.msk [vmem:[%s2413_s6 + $0x18] sm:$0xff] %vm558_vm2, %v1560_v20  ;;  %v1373_v47 = vmul.f32 %v2162_v8, %v740_v46  ;;  %v1530_v16 = vadd.f32 %v2354_v23, %v1491_v12  ;;  %v1473_v25 = vmul.f32 %v2244_v11, %v840_v14  ;;  %v1504_v7 = vadd.f32 %v1472_v49, %v2538_v37  ;;  %v745_v46 = vld [vmem:[#allocation2 + $0x151] sm:$0xff]  ;;  %v743_v20 = vld [vmem:[#allocation2 + $0x139] sm:$0xff] }
 0x12f   : > { %1593 = vst.msk [vmem:[%s2413_s6 + $0x20] sm:$0xff] %vm558_vm2, %v1561_v42  ;;  %v697_v58 = vmul.f32 %v2116_v26, %v661_v9  ;;  %v1307_v13 = vadd.f32 %v2578_v4, %v1206_v53  ;;  %v1406_v52 = vadd.f32 %v2421_v39, %v1306_v31  ;;  %v765_v10 = vmul.f32 %v2119_v27, %v729_v48  ;;  %v675_v18 = vld [vmem:[#allocation2 + $0x138] sm:$0xff] }
 0x130   : > { %v1405_v45 = vadd.f32 %v1373_v47, %v1305_v30  ;;  %v2644_v38 = vadd.f32 %v2533_v15, %v892_v34  ;;  %v1562_v50 = vmax.f32 %v1530_v16, 0.0  ;;  %v1007_v14 = vadd.f32 %v2400_v55, %v907_v3  ;;  %v3208_v30 = vld [vmem:[#allocation19_spill] sm:$0xff] }
 0x131   : > { %v1543_v37 = vadd.f32 %v2354_v23, %v1504_v7  ;;  %v2649_v0 = vadd.f32 %v2562_v54, %v908_v44  ;;  %v1407_v4 = vadd.f32 %v2581_v17, %v1307_v13  ;;  %v1506_v39 = vadd.f32 %v2586_v2, %v1406_v52  ;;  %v730_v16 = vld [vmem:[#allocation2 + $0x99] sm:$0xff]  ;;  %v3209_v13 = vld [vmem:[#allocation37_spill] sm:$0xff] }
 0x132   : > { %v1505_v51 = vadd.f32 %v1473_v25, %v1405_v45  ;;  %1594 = vst.msk [vmem:[%s2413_s6 + $0x28] sm:$0xff] %vm558_vm2, %v1562_v50  ;;  %v2656_v15 = vmul.f32 %v2144_v56, %v661_v9  ;;  %v713_v34 = vmul.f32 %v2116_v26, %v677_v60  ;;  %v781_v55 = vmul.f32 %v2119_v27, %v745_v46  ;;  %v829_v52 = vld [vmem:[#allocation2 + $0x92] sm:$0xff] }
 0x133   : > { %v1575_v29 = vmax.f32 %v1543_v37, 0.0  ;;  %v1507_v36 = vadd.f32 %v2589_v5, %v1407_v4  ;;  %v1545_v24 = vadd.f32 %v2354_v23, %v1506_v39  ;;  %v797_v17 = vadd.f32 %v765_v10, %v697_v58  ;;  %v3210_v4 = vld [vmem:[#allocation38_spill] sm:$0xff] }
 0x134   : > { %v1544_v54 = vadd.f32 %v2354_v23, %v1505_v51  ;;  %v2666_v2 = vmul.f32 %v2147_v57, %v729_v48  ;;  %v2669_v19 = vmul.f32 %v2156_v1, %v661_v9  ;;  %v2672_v59 = vmul.f32 %v2162_v8, %v729_v48  ;;  %v3207_v48 = vld [vmem:[#allocation14_spill] sm:$0xff] }
 0x135   : > { %1607 = vst.msk [vmem:[%s2413_s6 + $0x90] sm:$0xff] %vm558_vm2, %v1575_v29  ;;  %v2675_v5 = vmul.f32 %v2144_v56, %v677_v60  ;;  %v1546_v32 = vadd.f32 %v2354_v23, %v1507_v36  ;;  %v1577_v22 = vmax.f32 %v1545_v24, 0.0  ;;  %v2678_v3 = vadd.f32 %v781_v55, %v713_v34  ;;  %v3211_v39 = vld [vmem:[#allocation22_spill] sm:$0xff]  ;;  %v830_v55 = vld [vmem:[#allocation2 + $0x9a] sm:$0xff] }
 0x136   : > { %v1576_v61 = vmax.f32 %v1544_v54, 0.0  ;;  %v695_v33 = vmul.f32 %v2116_v26, %v659_v41  ;;  %v763_v63 = vmul.f32 %v2119_v27, %v727_v62  ;;  %v961_v6 = vmul.f32 %v2144_v56, %v659_v41 }
 0x137   : > { %v1091_v9 = vadd.f32 %v2386_v35, %v2612_v40  ;;  %v1578_v12 = vmax.f32 %v1546_v32, 0.0  ;;  %1609 = vst.msk [vmem:[%s2413_s6 + $0xa0] sm:$0xff] %vm558_vm2, %v1577_v22  ;;  %v2690_v42 = vmul.f32 %v2147_v57, %v745_v46  ;;  %v2693_v44 = vmul.f32 %v2156_v1, %v677_v60  ;;  %v662_v40 = vld [vmem:[#allocation2 + $0x98] sm:$0xff] }
 0x138   : > { %1608 = vst.msk [vmem:[%s2413_s6 + $0x98] sm:$0xff] %vm558_vm2, %v1576_v61  ;;  %v1260_v49 = vmul.f32 %v2156_v1, %v659_v41  ;;  %v993_v53 = vadd.f32 %v961_v6, %v3207_v48  ;;  %v711_v47 = vmul.f32 %v2116_v26, %v675_v18  ;;  %v779_v35 = vmul.f32 %v2119_v27, %v743_v20  ;;  %v678_v22 = vld [vmem:[#allocation2 + $0x158] sm:$0xff] }
 0x139   : > { %v1191_v31 = vadd.f32 %v3208_v30, %v1091_v9  ;;  %1610 = vst.msk [vmem:[%s2413_s6 + $0xa8] sm:$0xff] %vm558_vm2, %v1578_v12  ;;  %v2703_v25 = vmul.f32 %v2162_v8, %v745_v46  ;;  %v1061_v7 = vmul.f32 %v2147_v57, %v727_v62  ;;  %v977_v58 = vmul.f32 %v2144_v56, %v675_v18  ;;  %v846_v30 = vld [vmem:[#allocation2 + $0x15a] sm:$0xff] }
 0x13a   : > { %v1107_v45 = vadd.f32 %v3209_v13, %v1007_v14  ;;  %v2708_v10 = vadd.f32 %v763_v63, %v695_v33  ;;  %v1360_v50 = vmul.f32 %v2162_v8, %v727_v62  ;;  %v1276_v37 = vmul.f32 %v2156_v1, %v675_v18  ;;  %v746_v18 = vld [vmem:[#allocation2 + $0x159] sm:$0xff] }
 0x13b   : > { %v1292_v60 = vadd.f32 %v1260_v49, %v1191_v31  ;;  %v1009_v51 = vadd.f32 %v977_v58, %v3210_v4  ;;  %v698_v46 = vmul.f32 %v2116_v26, %v662_v40  ;;  %v766_v34 = vmul.f32 %v2119_v27, %v730_v16  ;;  %v845_v33 = vld [vmem:[#allocation2 + $0x152] sm:$0xff]  ;;  %v660_v58 = vld [vmem:[#allocation2 + $0x80] sm:$0xff] }
 0x13c   : > { %v1207_v29 = vadd.f32 %v3211_v39, %v1107_v45  ;;  %v1093_v36 = vadd.f32 %v1061_v7, %v993_v53  ;;  %v2716_v54 = vadd.f32 %v779_v35, %v711_v47  ;;  %v1077_v14 = vmul.f32 %v2147_v57, %v743_v20 }
 0x13d   : > { %v865_v24 = vmul.f32 %v2132_v43, %v829_v52  ;;  %v2720_v41 = vadd.f32 %v1360_v50, %v1292_v60  ;;  %v1376_v32 = vmul.f32 %v2162_v8, %v743_v20  ;;  %v798_v61 = vadd.f32 %v766_v34, %v698_v46  ;;  %v827_v50 = vld [vmem:[#allocation2 + $0x7a] sm:$0xff] }
 0x13e   : > { %v1308_v62 = vadd.f32 %v1276_v37, %v1207_v29  ;;  %v2723_v63 = vadd.f32 %v1077_v14, %v1009_v51  ;;  %v866_v6 = vmul.f32 %v2132_v43, %v830_v55  ;;  %v2727_v9 = vmul.f32 %v2144_v56, %v662_v40 }
 0x13f   : > { %v2730_v12 = vmul.f32 %v2147_v57, %v730_v16  ;;  %v2732_v49 = vadd.f32 %v865_v24, %v797_v17  ;;  %v2735_v48 = vmul.f32 %v2176_v21, %v829_v52  ;;  %v2738_v20 = vmul.f32 %v2176_v21, %v830_v55 }
 0x140   : > { %v1263_v53 = vmul.f32 %v2156_v1, %v662_v40  ;;  %v2741_v31 = vadd.f32 %v1376_v32, %v1308_v62  ;;  %v714_v47 = vmul.f32 %v2116_v26, %v678_v22  ;;  %v782_v35 = vmul.f32 %v2119_v27, %v746_v18  ;;  %v728_v40 = vld [vmem:[#allocation2 + $0x81] sm:$0xff] }
 0x141   : > { %3212 = vst [vmem:[#allocation17_spill] sm:$0xff] %v2730_v12  ;;  %3213 = vst [vmem:[#allocation14_spill] sm:$0xff] %v2738_v20  ;;  %v881_v7 = vmul.f32 %v2132_v43, %v845_v33  ;;  %v2746_v17 = vadd.f32 %v866_v6, %v798_v61  ;;  %v1363_v13 = vmul.f32 %v2162_v8, %v730_v16  ;;  %v828_v62 = vld [vmem:[#allocation2 + $0x82] sm:$0xff] }
 0x142   : > { %v1462_v45 = vmul.f32 %v2244_v11, %v829_v52  ;;  %v2751_v60 = vmul.f32 %v2244_v11, %v830_v55  ;;  %v814_v37 = vadd.f32 %v782_v35, %v714_v47  ;;  %v882_v4 = vmul.f32 %v2132_v43, %v846_v30  ;;  %v3219_v61 = vld [vmem:[#allocation25_spill] sm:$0xff] }
 0x143   : > { %3214 = vst [vmem:[#allocation19_spill] sm:$0xff] %v2746_v17  ;;  %v2755_v51 = vmul.f32 %v2144_v56, %v678_v22  ;;  %v2758_v39 = vmul.f32 %v2147_v57, %v746_v18  ;;  %v2761_v29 = vadd.f32 %v881_v7, %v2678_v3  ;;  %v2764_v16 = vmul.f32 %v2176_v21, %v845_v33 }
 0x144   : > { %v2767_v52 = vmul.f32 %v2176_v21, %v846_v30  ;;  %v696_v46 = vmul.f32 %v2116_v26, %v660_v58  ;;  %v2771_v34 = vmul.f32 %v2156_v1, %v678_v22  ;;  %v2774_v55 = vmul.f32 %v2162_v8, %v746_v18 }
 0x145   : > { %3215 = vst [vmem:[#allocation37_spill] sm:$0xff] %v2758_v39  ;;  %3216 = vst [vmem:[#allocation38_spill] sm:$0xff] %v2761_v29  ;;  %v764_v14 = vmul.f32 %v2119_v27, %v728_v40  ;;  %v863_v24 = vmul.f32 %v2132_v43, %v827_v50  ;;  %v2779_v3 = vmul.f32 %v2244_v11, %v845_v33  ;;  %v3222_v33 = vld [vmem:[#allocation15_spill] sm:$0xff]  ;;  %v744_v29 = vld [vmem:[#allocation2 + $0x141] sm:$0xff] }
 0x146   : > { %3217 = vst [vmem:[#allocation22_spill] sm:$0xff] %v2764_v16  ;;  %3218 = vst [vmem:[#allocation40_spill] sm:$0xff] %v2767_v52  ;;  %v962_v32 = vmul.f32 %v2144_v56, %v660_v58  ;;  %v1092_v6 = vadd.f32 %v3219_v61, %v2644_v38  ;;  %v1161_v47 = vmul.f32 %v2176_v21, %v827_v50  ;;  %v3221_v52 = vld [vmem:[#allocation23_spill] sm:$0xff]  ;;  %v676_v16 = vld [vmem:[#allocation2 + $0x140] sm:$0xff] }
 0x147   : > { %v2785_v22 = vadd.f32 %v882_v4, %v814_v37  ;;  %v2788_v18 = vmul.f32 %v2244_v11, %v846_v30  ;;  %v796_v35 = vadd.f32 %v764_v14, %v696_v46  ;;  %v1062_v7 = vmul.f32 %v2147_v57, %v728_v40 }
 0x148   : > { %v994_v39 = vadd.f32 %v962_v32, %v3221_v52  ;;  %v1192_v20 = vadd.f32 %v3222_v33, %v1092_v6  ;;  %v1193_v17 = vadd.f32 %v1161_v47, %v1093_v36  ;;  %v1261_v12 = vmul.f32 %v2156_v1, %v660_v58  ;;  %v843_v32 = vld [vmem:[#allocation2 + $0x13a] sm:$0xff]  ;;  %v844_v33 = vld [vmem:[#allocation2 + $0x142] sm:$0xff] }
 0x149   : > { %3220 = vst [vmem:[#allocation25_spill] sm:$0xff] %v2785_v22  ;;  %v864_v38 = vmul.f32 %v2132_v43, %v828_v62  ;;  %v895_v37 = vadd.f32 %v863_v24, %v2708_v10  ;;  %v1162_v4 = vmul.f32 %v2176_v21, %v828_v62  ;;  %v1460_v30 = vmul.f32 %v2244_v11, %v827_v50 }
 0x14a   : > { %v1094_v46 = vadd.f32 %v1062_v7, %v994_v39  ;;  %v1293_v14 = vadd.f32 %v1261_v12, %v1192_v20  ;;  %v1294_v61 = vadd.f32 %v2669_v19, %v1193_v17  ;;  %v1361_v52 = vmul.f32 %v2162_v8, %v728_v40 }
 0x14b   : > { %v896_v36 = vadd.f32 %v864_v38, %v796_v35  ;;  %v1492_v58 = vadd.f32 %v1460_v30, %v2720_v41  ;;  %v712_v6 = vmul.f32 %v2116_v26, %v676_v16  ;;  %v780_v47 = vmul.f32 %v2119_v27, %v744_v29  ;;  %v3223_v30 = vld [vmem:[#allocation16_spill] sm:$0xff] }
 0x14c   : > { %v1194_v10 = vadd.f32 %v1162_v4, %v1094_v46  ;;  %v1393_v24 = vadd.f32 %v1361_v52, %v1293_v14  ;;  %v1394_v22 = vadd.f32 %v2672_v59, %v1294_v61  ;;  %v1461_v50 = vmul.f32 %v2244_v11, %v828_v62  ;;  %v665_v14 = vld [vmem:[#allocation2 + $0xc0] sm:$0xff] }
 0x14d   : > { %v2806_v12 = vadd.f32 %v2656_v15, %v895_v37  ;;  %v1531_v19 = vadd.f32 %v2354_v23, %v1492_v58  ;;  %v879_v20 = vmul.f32 %v2132_v43, %v843_v32  ;;  %v978_v41 = vmul.f32 %v2144_v56, %v676_v16  ;;  %v3224_v58 = vld [vmem:[#allocation39_spill] sm:$0xff] }
 0x14e   : > { %v1295_v17 = vadd.f32 %v1263_v53, %v1194_v10  ;;  %v1493_v40 = vadd.f32 %v1461_v50, %v1393_v24  ;;  %v1494_v39 = vadd.f32 %v1462_v45, %v1394_v22  ;;  %v880_v35 = vmul.f32 %v2132_v43, %v844_v33 }
 0x14f   : > { %v1563_v7 = vmax.f32 %v1531_v19, 0.0  ;;  %v812_v38 = vadd.f32 %v780_v47, %v712_v6  ;;  %v1010_v59 = vadd.f32 %v978_v41, %v2605_v28  ;;  %v1078_v62 = vmul.f32 %v2147_v57, %v744_v29  ;;  %v733_v47 = vld [vmem:[#allocation2 + $0xc1] sm:$0xff] }
 0x150   : > { %v1395_v15 = vadd.f32 %v1363_v13, %v1295_v17  ;;  %v1532_v37 = vadd.f32 %v2354_v23, %v1493_v40  ;;  %v1533_v4 = vadd.f32 %v2354_v23, %v1494_v39  ;;  %v1108_v46 = vadd.f32 %v3223_v30, %v2649_v0 }
 0x151   : > { %1595 = vst.msk [vmem:[%s2413_s6 + $0x30] sm:$0xff] %vm558_vm2, %v1563_v7  ;;  %v911_v53 = vadd.f32 %v879_v20, %v2716_v54  ;;  %v1110_v45 = vadd.f32 %v1078_v62, %v1010_v59  ;;  %v1177_v22 = vmul.f32 %v2176_v21, %v843_v32  ;;  %v1178_v28 = vmul.f32 %v2176_v21, %v844_v33  ;;  %v663_v62 = vld [vmem:[#allocation2 + $0xa8] sm:$0xff] }
 0x152   : > { %v1495_v13 = vadd.f32 %v2751_v60, %v1395_v15  ;;  %v1564_v61 = vmax.f32 %v1532_v37, 0.0  ;;  %v1565_v52 = vmax.f32 %v1533_v4, 0.0  ;;  %v1208_v6 = vadd.f32 %v3224_v58, %v1108_v46  ;;  %v731_v15 = vld [vmem:[#allocation2 + $0xa9] sm:$0xff] }
 0x153   : > { %v912_v0 = vadd.f32 %v880_v35, %v812_v38  ;;  %v1209_v10 = vadd.f32 %v1177_v22, %v2723_v63  ;;  %v1210_v24 = vadd.f32 %v1178_v28, %v1110_v45  ;;  %v1277_v54 = vmul.f32 %v2156_v1, %v676_v16 }
 0x154   : > { %v1534_v50 = vadd.f32 %v2354_v23, %v1495_v13  ;;  %1596 = vst.msk [vmem:[%s2413_s6 + $0x38] sm:$0xff] %vm558_vm2, %v1564_v61  ;;  %1597 = vst.msk [vmem:[%s2413_s6 + $0x40] sm:$0xff] %vm558_vm2, %v1565_v52  ;;  %v1377_v19 = vmul.f32 %v2162_v8, %v744_v29  ;;  %v1476_v60 = vmul.f32 %v2244_v11, %v843_v32  ;;  %v679_v13 = vld [vmem:[#allocation2 + $0x168] sm:$0xff] }
 0x155   : > { %v701_v20 = vmul.f32 %v2116_v26, %v665_v14  ;;  %v1309_v41 = vadd.f32 %v1277_v54, %v1208_v6  ;;  %v1310_v17 = vadd.f32 %v2693_v44, %v1209_v10  ;;  %v1311_v63 = vadd.f32 %v2771_v34, %v1210_v24  ;;  %v947_v44 = vld [vmem:[#allocation2 + $0x180] sm:$0xff]  ;;  %v747_v61 = vld [vmem:[#allocation2 + $0x169] sm:$0xff] }
 0x156   : > { %v769_v16 = vmul.f32 %v2119_v27, %v733_v47  ;;  %v2839_v40 = vadd.f32 %v2727_v9, %v896_v36  ;;  %v1566_v39 = vmax.f32 %v1534_v50, 0.0  ;;  %v1011_v35 = vadd.f32 %v2675_v5, %v911_v53  ;;  %v666_v54 = vld [vmem:[#allocation2 + $0xc8] sm:$0xff] }
 0x157   : > { %v1508_v29 = vadd.f32 %v1476_v60, %v2741_v31  ;;  %v1409_v7 = vadd.f32 %v1377_v19, %v1309_v41  ;;  %v1410_v32 = vadd.f32 %v2703_v25, %v1310_v17  ;;  %v1411_v38 = vadd.f32 %v2774_v55, %v1311_v63  ;;  %v1047_v25 = vld [vmem:[#allocation2 + $0x181] sm:$0xff]  ;;  %v3226_v63 = vld [vmem:[#allocation38_spill] sm:$0xff] }
 0x158   : > { %v1477_v59 = vmul.f32 %v2244_v11, %v844_v33  ;;  %1598 = vst.msk [vmem:[%s2413_s6 + $0x48] sm:$0xff] %vm558_vm2, %v1566_v39  ;;  %v2849_v34 = vadd.f32 %v2755_v51, %v912_v0  ;;  %v2853_v36 = vmul.f32 %v2144_v56, %v665_v14  ;;  %v2856_v5 = vmul.f32 %v2147_v57, %v733_v47  ;;  %v833_v60 = vld [vmem:[#allocation2 + $0xc2] sm:$0xff]  ;;  %v3227_v39 = vld [vmem:[#allocation22_spill] sm:$0xff] }
 0x159   : > { %v1547_v9 = vadd.f32 %v2354_v23, %v1508_v29  ;;  %v1510_v55 = vadd.f32 %v2779_v3, %v1410_v32  ;;  %v1511_v11 = vadd.f32 %v2788_v18, %v1411_v38  ;;  %v801_v33 = vadd.f32 %v769_v16, %v701_v20  ;;  %v834_v38 = vld [vmem:[#allocation2 + $0xca] sm:$0xff] }
 0x15a   : > { %v1509_v31 = vadd.f32 %v1477_v59, %v1409_v7  ;;  %v2861_v37 = vmul.f32 %v2156_v1, %v665_v14  ;;  %v2864_v4 = vmul.f32 %v2162_v8, %v733_v47  ;;  %v2867_v30 = vmul.f32 %v2144_v56, %v947_v44 }
 0x15b   : > { %v1579_v51 = vmax.f32 %v1547_v9, 0.0  ;;  %v1549_v53 = vadd.f32 %v2354_v23, %v1510_v55  ;;  %v1550_v3 = vadd.f32 %v2354_v23, %v1511_v11  ;;  %v2873_v18 = vmul.f32 %v2147_v57, %v1047_v25 }
 0x15c   : > { %v1548_v46 = vadd.f32 %v2354_v23, %v1509_v31  ;;  %v699_v45 = vmul.f32 %v2116_v26, %v663_v62  ;;  %v767_v22 = vmul.f32 %v2119_v27, %v731_v15  ;;  %v965_v28 = vmul.f32 %v2144_v56, %v663_v62 }
 0x15d   : > { %1611 = vst.msk [vmem:[%s2413_s6 + $0xb0] sm:$0xff] %vm558_vm2, %v1579_v51  ;;  %v1095_v14 = vadd.f32 %v2666_v2, %v2806_v12  ;;  %v1581_v52 = vmax.f32 %v1549_v53, 0.0  ;;  %v1582_v58 = vmax.f32 %v1550_v3, 0.0  ;;  %v2883_v6 = vmul.f32 %v2156_v1, %v947_v44 }
 0x15e   : > { %v1580_v23 = vmax.f32 %v1548_v46, 0.0  ;;  %v2886_v47 = vmul.f32 %v2162_v8, %v1047_v25  ;;  %v997_v0 = vadd.f32 %v965_v28, %v2732_v49  ;;  %v1264_v24 = vmul.f32 %v2156_v1, %v663_v62  ;;  %v734_v49 = vld [vmem:[#allocation2 + $0xc9] sm:$0xff] }
 0x15f   : > { %v1195_v10 = vadd.f32 %v2735_v48, %v1095_v14  ;;  %1613 = vst.msk [vmem:[%s2413_s6 + $0xc0] sm:$0xff] %vm558_vm2, %v1581_v52  ;;  %1614 = vst.msk [vmem:[%s2413_s6 + $0xc8] sm:$0xff] %vm558_vm2, %v1582_v58  ;;  %v715_v2 = vmul.f32 %v2116_v26, %v679_v13  ;;  %v783_v12 = vmul.f32 %v2119_v27, %v747_v61  ;;  %v2918_v46 = vld [vmem:[#allocation2 + $0x188] sm:$0xff] }
 0x160   : > { %3225 = vst [vmem:[#allocation23_spill] sm:$0xff] %v2886_v47  ;;  %1612 = vst.msk [vmem:[%s2413_s6 + $0xb8] sm:$0xff] %vm558_vm2, %v1580_v23  ;;  %v981_v50 = vmul.f32 %v2144_v56, %v679_v13  ;;  %v1111_v19 = vadd.f32 %v2690_v42, %v1011_v35  ;;  %v799_v48 = vadd.f32 %v767_v22, %v699_v45  ;;  %v2924_v28 = vld [vmem:[#allocation2 + $0x189] sm:$0xff] }
 0x161   : > { %v1065_v20 = vmul.f32 %v2147_v57, %v731_v15  ;;  %v1296_v41 = vadd.f32 %v1264_v24, %v1195_v10  ;;  %v1364_v17 = vmul.f32 %v2162_v8, %v731_v15  ;;  %v1280_v7 = vmul.f32 %v2156_v1, %v679_v13  ;;  %3228 = vst [vmem:[#allocation15_spill] sm:$0xff] %v2924_v28  ;;  %v2926_v14 = vld [vmem:[#allocation2 + $0x182] sm:$0xff]  ;;  %v2928_v13 = vld [vmem:[#allocation2 + $0x18a] sm:$0xff] }
 0x162   : > { %v1013_v16 = vadd.f32 %v981_v50, %v3226_v63  ;;  %v1211_v29 = vadd.f32 %v3227_v39, %v1111_v19  ;;  %v702_v32 = vmul.f32 %v2116_v26, %v666_v54  ;;  %v1081_v42 = vmul.f32 %v2147_v57, %v747_v61  ;;  %3229 = vst [vmem:[#allocation16_spill] sm:$0xff] %v2928_v13  ;;  %v732_v10 = vld [vmem:[#allocation2 + $0xb1] sm:$0xff]  ;;  %v3233_v63 = vld [vmem:[#allocation9_spill] sm:$0xff] }
 0x163   : > { %v1097_v59 = vadd.f32 %v1065_v20, %v997_v0  ;;  %v770_v35 = vmul.f32 %v2119_v27, %v734_v49  ;;  %v869_v44 = vmul.f32 %v2132_v43, %v833_v60  ;;  %v2910_v9 = vadd.f32 %v1364_v17, %v1296_v41  ;;  %v664_v0 = vld [vmem:[#allocation2 + $0xb0] sm:$0xff]  ;;  %v3232_v41 = vld [vmem:[#allocation29_spill] sm:$0xff] }
 0x164   : > { %v2912_v25 = vadd.f32 %v783_v12, %v715_v2  ;;  %v1312_v31 = vadd.f32 %v1280_v7, %v1211_v29  ;;  %v1380_v55 = vmul.f32 %v2162_v8, %v747_v61  ;;  %v2915_v11 = vadd.f32 %v1081_v42, %v1013_v16  ;;  %v831_v24 = vld [vmem:[#allocation2 + $0xaa] sm:$0xff]  ;;  %v2938_v12 = vld [vmem:[%s3141_s3 + $0x8] ss:$0 sm:$0xff] }
 0x165   : > { %v802_v62 = vadd.f32 %v770_v35, %v702_v32  ;;  %v870_v15 = vmul.f32 %v2132_v43, %v834_v38  ;;  %v901_v51 = vadd.f32 %v869_v44, %v801_v33  ;;  %v968_v53 = vmul.f32 %v2144_v56, %v666_v54  ;;  %v3231_v33 = vld [vmem:[#allocation8_spill] sm:$0xff]  ;;  %v3236_v35 = vld [vmem:[#allocation31_spill] sm:$0xff] }
 0x166   : > { %v1068_v3 = vmul.f32 %v2147_v57, %v734_v49  ;;  %v1167_v45 = vmul.f32 %v2176_v21, %v833_v60  ;;  %v1168_v22 = vmul.f32 %v2176_v21, %v834_v38  ;;  %v2930_v61 = vadd.f32 %v1380_v55, %v1312_v31 }
 0x167   : > { %v902_v23 = vadd.f32 %v870_v15, %v802_v62  ;;  %v1001_v52 = vadd.f32 %v3231_v33, %v901_v51  ;;  %v1267_v58 = vmul.f32 %v2156_v1, %v666_v54  ;;  %v1367_v2 = vmul.f32 %v2162_v8, %v734_v49  ;;  %v832_v54 = vld [vmem:[#allocation2 + $0xb2] sm:$0xff] }
 0x168   : > { %3230 = vst [vmem:[#allocation39_spill] sm:$0xff] %v2930_v61  ;;  %v1466_v50 = vmul.f32 %v2938_v12, %v833_v60  ;;  %v2942_v19 = vmul.f32 %v2938_v12, %v834_v38  ;;  %v2946_v20 = vmul.f32 %v2144_v56, %v2918_v46  ;;  %v2952_v49 = vmul.f32 %v2147_v57, %v2924_v28  ;;  %v3235_v38 = vld [vmem:[#allocation30_spill] sm:$0xff]  ;;  %v3240_v28 = vld [vmem:[#allocation19_spill] sm:$0xff] }
 0x169   : > { %v1002_v17 = vadd.f32 %v3232_v41, %v902_v23  ;;  %v1101_v16 = vadd.f32 %v3233_v63, %v1001_v52  ;;  %v2956_v39 = vmul.f32 %v2176_v21, %v2926_v14  ;;  %v2960_v60 = vmul.f32 %v2176_v21, %v2928_v13  ;;  %v3237_v23 = vld [vmem:[#allocation17_spill] sm:$0xff]  ;;  %v3238_v52 = vld [vmem:[#allocation32_spill] sm:$0xff]  ;;  %v3239_v63 = vld [vmem:[#allocation6_spill] sm:$0xff] }
 0x16a   : > { %v700_v29 = vmul.f32 %v2116_v26, %v664_v0  ;;  %v768_v7 = vmul.f32 %v2119_v27, %v732_v10  ;;  %v867_v32 = vmul.f32 %v2132_v43, %v831_v24  ;;  %v868_v31 = vmul.f32 %v2132_v43, %v832_v54 }
 0x16b   : > { %3234 = vst [vmem:[#allocation38_spill] sm:$0xff] %v2960_v60  ;;  %v1102_v42 = vadd.f32 %v3235_v38, %v1002_v17  ;;  %v1201_v44 = vadd.f32 %v3236_v35, %v1101_v16  ;;  %v966_v55 = vmul.f32 %v2144_v56, %v664_v0  ;;  %v1066_v51 = vmul.f32 %v2147_v57, %v732_v10  ;;  %v3243_v60 = vld [vmem:[#allocation7_spill] sm:$0xff] }
 0x16c   : > { %v800_v62 = vadd.f32 %v768_v7, %v700_v29  ;;  %v899_v15 = vadd.f32 %v867_v32, %v799_v48  ;;  %v1096_v33 = vadd.f32 %v3237_v23, %v2839_v40  ;;  %v1165_v17 = vmul.f32 %v2176_v21, %v831_v24  ;;  %v3241_v29 = vld [vmem:[#allocation14_spill] sm:$0xff]  ;;  %v3242_v7 = vld [vmem:[#allocation24_spill] sm:$0xff] }
 0x16d   : > { %v1202_v41 = vadd.f32 %v3238_v52, %v1102_v42  ;;  %v1302_v13 = vadd.f32 %v3239_v63, %v1201_v44  ;;  %v998_v47 = vadd.f32 %v966_v55, %v3240_v28  ;;  %v1166_v35 = vmul.f32 %v2176_v21, %v832_v54 }
 0x16e   : > { %v900_v16 = vadd.f32 %v868_v31, %v800_v62  ;;  %v999_v38 = vadd.f32 %v2853_v36, %v899_v15  ;;  %v1196_v48 = vadd.f32 %v3241_v29, %v1096_v33  ;;  %v1197_v23 = vadd.f32 %v1165_v17, %v1097_v59  ;;  %v3244_v31 = vld [vmem:[#allocation26_spill] sm:$0xff]  ;;  %v3245_v36 = vld [vmem:[#allocation27_spill] sm:$0xff]  ;;  %v3246_v59 = vld [vmem:[#allocation28_spill] sm:$0xff] }
 0x16f   : > { %v1303_v32 = vadd.f32 %v3242_v7, %v1202_v41  ;;  %v1402_v61 = vadd.f32 %v3243_v60, %v1302_v13  ;;  %v1098_v40 = vadd.f32 %v1066_v51, %v998_v47  ;;  %v1265_v28 = vmul.f32 %v2156_v1, %v664_v0  ;;  %v3247_v60 = vld [vmem:[#allocation10_spill] sm:$0xff]  ;;  %v3249_v7 = vld [vmem:[#allocation11_spill] sm:$0xff] }
 0x170   : > { %v1000_v42 = vadd.f32 %v968_v53, %v900_v16  ;;  %v1099_v44 = vadd.f32 %v2856_v5, %v999_v38  ;;  %v1365_v55 = vmul.f32 %v2162_v8, %v732_v10  ;;  %v1298_v33 = vadd.f32 %v2861_v37, %v1197_v23  ;;  %v2992_v5 = vld [vmem:[%s3142_s4] ss:$0 sm:$0xff] }
 0x171   : > { %v1403_v62 = vadd.f32 %v3244_v31, %v1303_v32  ;;  %v1502_v15 = vadd.f32 %v3245_v36, %v1402_v61  ;;  %v1198_v52 = vadd.f32 %v1166_v35, %v1098_v40  ;;  %v1297_v29 = vadd.f32 %v1265_v28, %v1196_v48  ;;  %v3248_v35 = vld [vmem:[#allocation33_spill] sm:$0xff]  ;;  %v748_v32 = vld [vmem:[#allocation2 + $0x171] sm:$0xff] }
 0x172   : > { %v1100_v63 = vadd.f32 %v1068_v3, %v1000_v42  ;;  %v1199_v41 = vadd.f32 %v1167_v45, %v1099_v44  ;;  %v1464_v47 = vmul.f32 %v2938_v12, %v831_v24  ;;  %v1398_v61 = vadd.f32 %v2864_v4, %v1298_v33  ;;  %v680_v24 = vld [vmem:[#allocation2 + $0x170] sm:$0xff]  ;;  %v3251_v28 = vld [vmem:[#allocation35_spill] sm:$0xff] }
 0x173   : > { %v1503_v53 = vadd.f32 %v3246_v59, %v1403_v62  ;;  %v1541_v13 = vadd.f32 %v2992_v5, %v1502_v15  ;;  %v1299_v0 = vadd.f32 %v1267_v58, %v1198_v52  ;;  %v1397_v3 = vadd.f32 %v1365_v55, %v1297_v29  ;;  %v847_v40 = vld [vmem:[#allocation2 + $0x16a] sm:$0xff]  ;;  %v848_v62 = vld [vmem:[#allocation2 + $0x172] sm:$0xff]  ;;  %v3252_v52 = vld [vmem:[#allocation36_spill] sm:$0xff] }
 0x174   : > { %v1200_v10 = vadd.f32 %v1168_v22, %v1100_v63  ;;  %v1300_v37 = vadd.f32 %v3247_v60, %v1199_v41  ;;  %v1465_v45 = vmul.f32 %v2938_v12, %v832_v54  ;;  %v1496_v38 = vadd.f32 %v1464_v47, %v2910_v9  ;;  %v3250_v44 = vld [vmem:[#allocation34_spill] sm:$0xff] }
 0x175   : > { %v1542_v51 = vadd.f32 %v2992_v5, %v1503_v53  ;;  %v1573_v17 = vmax.f32 %v1541_v13, 0.0  ;;  %v1399_v16 = vadd.f32 %v1367_v2, %v1299_v0  ;;  %v1498_v22 = vadd.f32 %v1466_v50, %v1398_v61 }
 0x176   : > { %v1301_v48 = vadd.f32 %v3248_v35, %v1200_v10  ;;  %v1400_v58 = vadd.f32 %v3249_v7, %v1300_v37  ;;  %v1497_v4 = vadd.f32 %v1465_v45, %v1397_v3  ;;  %v1535_v42 = vadd.f32 %v2992_v5, %v1496_v38  ;;  %v3254_v45 = vld [vmem:[#allocation25_spill] sm:$0xff]  ;;  %v3255_v35 = vld [vmem:[#allocation40_spill] sm:$0xff] }
 0x177   : > { %v1574_v23 = vmax.f32 %v1542_v51, 0.0  ;;  %1605 = vst.msk [vmem:[%s2413_s6 + $0x80] sm:$0xff] %vm558_vm2, %v1573_v17  ;;  %v1499_v54 = vadd.f32 %v2942_v19, %v1399_v16  ;;  %v716_v2 = vmul.f32 %v2116_v26, %v680_v24  ;;  %v1537_v50 = vadd.f32 %v2992_v5, %v1498_v22 }
 0x178   : > { %v1401_v9 = vadd.f32 %v3250_v44, %v1301_v48  ;;  %v1500_v55 = vadd.f32 %v3251_v28, %v1400_v58  ;;  %v1536_v31 = vadd.f32 %v2992_v5, %v1497_v4  ;;  %v1567_v19 = vmax.f32 %v1535_v42, 0.0  ;;  %v3257_v42 = vld [vmem:[#allocation38_spill] sm:$0xff] }
 0x179   : > { %1606 = vst.msk [vmem:[%s2413_s6 + $0x88] sm:$0xff] %vm558_vm2, %v1574_v23  ;;  %v1538_v36 = vadd.f32 %v2992_v5, %v1499_v54  ;;  %v784_v15 = vmul.f32 %v2119_v27, %v748_v32  ;;  %v883_v26 = vmul.f32 %v2132_v43, %v847_v40  ;;  %v1569_v29 = vmax.f32 %v1537_v50, 0.0  ;;  %v3256_v54 = vld [vmem:[#allocation39_spill] sm:$0xff] }
 0x17a   : > { %v1501_v33 = vadd.f32 %v3252_v52, %v1401_v9  ;;  %v1539_v63 = vadd.f32 %v2992_v5, %v1500_v55  ;;  %v1568_v41 = vmax.f32 %v1536_v31, 0.0  ;;  %1599 = vst.msk [vmem:[%s2413_s6 + $0x50] sm:$0xff] %vm558_vm2, %v1567_v19  ;;  %v884_v53 = vmul.f32 %v2132_v43, %v848_v62  ;;  %v3261_v31 = vld [vmem:[#allocation18_spill] sm:$0xff] }
 0x17b   : > { %v1570_v47 = vmax.f32 %v1538_v36, 0.0  ;;  %v816_v59 = vadd.f32 %v784_v15, %v716_v2  ;;  %v915_v13 = vadd.f32 %v883_v26, %v2912_v25  ;;  %v1283_v27 = vmul.f32 %v2156_v1, %v2918_v46  ;;  %1601 = vst.msk [vmem:[%s2413_s6 + $0x60] sm:$0xff] %vm558_vm2, %v1569_v29  ;;  %v3253_v25 = vld [vmem:[#allocation37_spill] sm:$0xff]  ;;  %v3258_v2 = vld [vmem:[#allocation12_spill] sm:$0xff] }
 0x17c   : > { %v1540_v0 = vadd.f32 %v2992_v5, %v1501_v33  ;;  %v1571_v61 = vmax.f32 %v1539_v63, 0.0  ;;  %1600 = vst.msk [vmem:[%s2413_s6 + $0x58] sm:$0xff] %vm558_vm2, %v1568_v41  ;;  %v982_v10 = vmul.f32 %v2144_v56, %v680_v24  ;;  %v1112_v37 = vadd.f32 %v3253_v25, %v2849_v34  ;;  %v3263_v26 = vld [vmem:[#allocation16_spill] sm:$0xff]  ;;  %v3265_v29 = vld [vmem:[#allocation21_spill] sm:$0xff] }
 0x17d   : > { %1602 = vst.msk [vmem:[%s2413_s6 + $0x68] sm:$0xff] %vm558_vm2, %v1570_v47  ;;  %v916_v60 = vadd.f32 %v884_v53, %v816_v59  ;;  %v1015_v43 = vadd.f32 %v2867_v30, %v915_v13  ;;  %v1181_v46 = vmul.f32 %v2176_v21, %v847_v40  ;;  %v1082_v17 = vmul.f32 %v2147_v57, %v748_v32 }
 0x17e   : > { %v1572_v3 = vmax.f32 %v1540_v0, 0.0  ;;  %1603 = vst.msk [vmem:[%s2413_s6 + $0x70] sm:$0xff] %vm558_vm2, %v1571_v61  ;;  %v1014_v51 = vadd.f32 %v982_v10, %v3254_v45  ;;  %v1281_v16 = vmul.f32 %v2156_v1, %v680_v24  ;;  %v1212_v30 = vadd.f32 %v3255_v35, %v1112_v37  ;;  %v1449_v24 = vld [vmem:[#allocation2 + $0x1a2] sm:$0xff] }
 0x17f   : > { %v1016_v56 = vadd.f32 %v2946_v20, %v916_v60  ;;  %v1115_v38 = vadd.f32 %v2873_v18, %v1015_v43  ;;  %v1213_v48 = vadd.f32 %v1181_v46, %v2915_v11  ;;  %v1182_v7 = vmul.f32 %v2176_v21, %v848_v62 }
 0x180   : > { %1604 = vst.msk [vmem:[%s2413_s6 + $0x78] sm:$0xff] %vm558_vm2, %v1572_v3  ;;  %v1114_v34 = vadd.f32 %v1082_v17, %v1014_v51  ;;  %v1381_v58 = vmul.f32 %v2162_v8, %v748_v32  ;;  %v1480_v4 = vmul.f32 %v2938_v12, %v847_v40  ;;  %v1313_v20 = vadd.f32 %v1281_v16, %v1212_v30 }
 0x181   : > { %v1116_v57 = vadd.f32 %v2952_v49, %v1016_v56  ;;  %v1215_v1 = vadd.f32 %v2956_v39, %v1115_v38  ;;  %v1314_v18 = vadd.f32 %v2883_v6, %v1213_v48  ;;  %v1482_v11 = vmul.f32 %v2938_v12, %v2926_v14  ;;  %v3259_v49 = vld [vmem:[#allocation23_spill] sm:$0xff] }
 0x182   : > { %v1214_v22 = vadd.f32 %v1182_v7, %v1114_v34  ;;  %v1481_v23 = vmul.f32 %v2938_v12, %v848_v62  ;;  %v1512_v21 = vadd.f32 %v1480_v4, %v3256_v54  ;;  %v1413_v44 = vadd.f32 %v1381_v58, %v1313_v20  ;;  %v3260_v39 = vld [vmem:[#allocation15_spill] sm:$0xff]  ;;  %v3262_v62 = vld [vmem:[#allocation13_spill] sm:$0xff] }
 0x183   : > { %v1216_v32 = vadd.f32 %v3257_v42, %v1116_v57  ;;  %v1316_v40 = vadd.f32 %v3258_v2, %v1215_v1  ;;  %v1414_v9 = vadd.f32 %v3259_v49, %v1314_v18  ;;  %v1383_v28 = vmul.f32 %v2162_v8, %v3260_v39  ;;  %v3264_v8 = vld [vmem:[#allocation20_spill] sm:$0xff] }
 0x184   : > { %v1315_v6 = vadd.f32 %v1283_v27, %v1214_v22  ;;  %v1485_v55 = vmul.f32 %v2938_v12, %v1449_v24  ;;  %v1551_v14 = vadd.f32 %v2992_v5, %v1512_v21  ;;  %v1513_v19 = vadd.f32 %v1481_v23, %v1413_v44 }
 0x185   : > { %v1317_v50 = vadd.f32 %v3261_v31, %v1216_v32  ;;  %v1416_v36 = vadd.f32 %v3262_v62, %v1316_v40  ;;  %v1514_v15 = vadd.f32 %v1482_v11, %v1414_v9  ;;  %v1483_v52 = vmul.f32 %v2938_v12, %v3263_v26 }
 0x186   : > { %v1415_v33 = vadd.f32 %v1383_v28, %v1315_v6  ;;  %v1583_v63 = vmax.f32 %v1551_v14, 0.0  ;;  %v1552_v59 = vadd.f32 %v2992_v5, %v1513_v19 }
 0x187   : > { %v1417_v41 = vadd.f32 %v3264_v8, %v1317_v50  ;;  %v1516_v47 = vadd.f32 %v3265_v29, %v1416_v36  ;;  %v1553_v53 = vadd.f32 %v2992_v5, %v1514_v15 }
 0x188   : > { %v1515_v13 = vadd.f32 %v1483_v52, %v1415_v33  ;;  %1615 = vst.msk [vmem:[%s2413_s6 + $0xd0] sm:$0xff] %vm558_vm2, %v1583_v63  ;;  %v1584_v0 = vmax.f32 %v1552_v59, 0.0 }
 0x189   : > { %v1517_v27 = vadd.f32 %v1485_v55, %v1417_v41  ;;  %v1555_v12 = vadd.f32 %v2992_v5, %v1516_v47  ;;  %v1585_v61 = vmax.f32 %v1553_v53, 0.0 }
 0x18a   : > { %v1554_v10 = vadd.f32 %v2992_v5, %v1515_v13  ;;  %1616 = vst.msk [vmem:[%s2413_s6 + $0xd8] sm:$0xff] %vm558_vm2, %v1584_v0 }
 0x18b   : > { %v1556_v60 = vadd.f32 %v2992_v5, %v1517_v27  ;;  %v1587_v43 = vmax.f32 %v1555_v12, 0.0  ;;  %1617 = vst.msk [vmem:[%s2413_s6 + $0xe0] sm:$0xff] %vm558_vm2, %v1585_v61 }
 0x18c   : > { %v1586_v25 = vmax.f32 %v1554_v10, 0.0 }
 0x18d   : > { %v1588_v37 = vmax.f32 %v1556_v60, 0.0  ;;  %1619 = vst.msk [vmem:[%s2413_s6 + $0xf0] sm:$0xff] %vm558_vm2, %v1587_v43 }
 0x18e   : > { %1618 = vst.msk [vmem:[%s2413_s6 + $0xe8] sm:$0xff] %vm558_vm2, %v1586_v25 }
 0x18f   : > { %1620 = vst.msk [vmem:[%s2413_s6 + $0xf8] sm:$0xff] %vm558_vm2, %v1588_v37 }
 0x190   : > { %1874 = shalt.err (!%p1871_p3)
}
 0x191   : > { %s1875_s23 = scalar_lea.hbm %s3086_s15, 4096  ;;  %s1879_s7 = scalar_lea.hbm %s3143_s5, 8192 }
 0x192   : > { %p1876_p4 = scmp.ne.s32.totalorder %s3086_s15, %s1875_s23  ;;  %p1880_p9 = scmp.lt.s32.totalorder %s3086_s15, %s3143_s5 }
 0x193   : > { %p1881_p10 = scmp.lt.s32.totalorder %s1879_s7, %s1875_s23 }
 0x194   : > { %p1877_p7 = pnand %p1876_p4, %p1995_p5 }
 0x195   : > { %p1882_p11 = por %p1881_p10, %p1880_p9 }
 0x196   : > { %p1878_p8 = pneg %p1877_p7 }
 0x198   : > { %p1883_p12 = pnand %p1882_p11, %p1878_p8 }
 0x19a   : > { %1886 = shalt.err (!%p1883_p12)
}
 0x19b   : > { %s1925_s10 = smov 128   ;;  %s1926_s11 = smov 8  }
 0x19c   : > { %1801 = dma.vmem_to_hbm [thread:$0]  (%p1995_p5), %s3088_s12, 4096, %s3086_s15, %s3098_s22, %s1925_s10, %s1925_s10, %s1926_s11  }
 0x19d PF: > { %p1807_p13 = scmp.ge.s32.totalorder %s1921_s21, 2  ;;  %s1650_s13 = sand.u32 1, %s1909_s18  }
 0x19e   : > { %s1651_s14 = scalar_lea.sflag [#allocation4], %s1650_s13 }
 0x19f   : > { %p1804_p0 = pnand %p1807_p13, %p1999_p6 }
 0x1a1   : > { %p1805_p1 = pneg %p1804_p0 }
 0x1a3   : > { %1904 = dma.done.wait (%p1805_p1), %s1651_s14, 4096  }
 0x1a4   : > { %1906 = vsyncadd (%p1805_p1), %s1651_s14, 4294963200  ;;  %p15_p2 = scmp.ge.s32.totalorder %s1982_s24, 4   ;;  %s3266_s18 = smov %s1913_s19 }
 0x1a5   : > { %s3267_s19 = smov %s1917_s20  ;;  %s3268_s20 = smov %s1993_s27 }
 0x1a6   : > { %s3269_s21 = smov %s1982_s24  ;;  %17 = sbr.rel (!%p15_p2) target bundleno = 3 (0x3), region = 77 }
 0x1ab   :  { %1656 = vsyncpa [#allocation4], 1 }
 0x1ac   :  { %1658 = vsyncpa [#allocation4 + $0x1], 1 }

</bundles_post_ra>
